<compile_context>
chip_gen: v5e
topology: v5e:2x2
jax: 0.10.0
libtpu: 0.0.40
codegen_flags: <defaults>
</compile_context>

<pallas_src>
import functools

import jax
import jax.numpy as jnp
from jax import lax
from jax.experimental import pallas as pl
from jax.experimental.pallas import tpu as pltpu

_BIG = 1e30


# ----------------------------- config (deterministic, in-script) -------------
class Cfg:
    type = "cvae"
    distance_type = "hausdorff"
    collision_type = "local_dis"
    scale_waypoints = 0.5
    hausdorff_dis = "average"        # TODO(synk): HausdorffLoss source not given;
                                     # using symmetric average Hausdorff.
    last_ratio = 1.0
    vae_kld_ratio = 0.01
    dlow_kld_ratio = 0.0
    distance_ratio = 1.0
    diversity_ratio = 0.0
    collision_mean_ratio = 0.5
    collision_max_ratio = 0.5
    coverage_distance_ratio = 0.0
    coverage_last_ratio = 0.0
    coverage_with_last = False
    coverage_diverse_ratio = 0.0
    asymmetric_ratio = 0.0
    dlow_sigma = 1.0
    local_map_resolution = 0.1
    collision_threshold = 0.3
    local_map_threshold = 8.0


CFG = Cfg()


# ----------------------------- Pallas kernel --------------------------------
def _loss_kernel(slab_ref, tri_ref, coords_ref, occ_ref,        # inputs
                 stats_ref,                                      # output
                 posx_ref, posy_ref, ax_ref, ay_ref, pnorm_ref,  # scratch
                 dmin_ref, csq_ref,
                 *, inv_res, res, map_thresh, K):
    p_idx = pl.program_id(1)
    n_p = pl.num_programs(1)

    # ---- per-batch-tile setup: runs once (pixel axis is innermost) ----------
    @pl.when(p_idx == 0)
    def _init():
        slab = slab_ref[...]
        yhx = slab[:, 0:K]
        yhy = slab[:, K:2 * K]
        tri = tri_ref[...]
        # scaled cumulative sum of waypoints (tiny MXU matmul, once per tile)
        pos_x = jnp.dot(yhx, tri, preferred_element_type=jnp.float32)
        pos_y = jnp.dot(yhy, tri, preferred_element_type=jnp.float32)
        fx = pos_x * inv_res + map_thresh
        fy = pos_y * inv_res + map_thresh
        # truncation toward zero == torch .to(torch.int)
        px = jnp.where(fx >= 0.0, jnp.floor(fx), jnp.ceil(fx))
        py = jnp.where(fy >= 0.0, jnp.floor(fy), jnp.ceil(fy))
        posx_ref[...] = pos_x
        posy_ref[...] = pos_y
        ax_ref[...] = -2.0 * px
        ay_ref[...] = -2.0 * py
        pnorm_ref[...] = px * px + py * py
        dmin_ref[...] = jnp.full(dmin_ref.shape, _BIG, jnp.float32)

    # ---- hot loop: running min of squared pixel distance over pixel chunks --
    #   (px - r)^2 + (py - c)^2
    #     = [-2 px r - 2 py c + (r^2 + c^2 | BIG if free)] + (px^2 + py^2)
    # The bracket is minimized over pixels here; the path-pixel norm is added
    # after the min in finalize.
    rowc = coords_ref[0:1, :]                      # (1, PT)
    colc = coords_ref[1:2, :]                      # (1, PT)
    rc2 = coords_ref[2:3, :]                       # (1, PT) r^2 + c^2
    occ_f = occ_ref[...].astype(jnp.float32)       # (BT, PT) int8 -> f32
    csq_ref[...] = jnp.where(occ_f > 0.0, rc2, _BIG)

    ax = ax_ref[...]                               # (BT, K)
    ay = ay_ref[...]
    mins = []
    for k in range(K):                             # short static unroll
        part = ax[:, k:k + 1] * rowc + ay[:, k:k + 1] * colc + csq_ref[...]
        mins.append(jnp.min(part, axis=1, keepdims=True))     # (BT, 1)
    dmin_ref[...] = jnp.minimum(dmin_ref[...], jnp.concatenate(mins, axis=1))

    # ---- finalize on the last pixel chunk -----------------------------------
    @pl.when(p_idx == n_p - 1)
    def _finalize():
        # local collision loss (clamp + arctanh of min pixel distance)
        dsq = jnp.maximum(dmin_ref[...] + pnorm_ref[...], 0.0)
        dmin_pix = jnp.sqrt(dsq) * res
        d_path = 1.0 - jnp.clip(dmin_pix, 1e-4, 0.999)
        atanh = 0.5 * jnp.log((1.0 + d_path) / (1.0 - d_path))
        coll = jnp.mean(atanh, axis=1, keepdims=True)          # (BT, 1)

        # symmetric average Hausdorff; one (BT,K,K) tensor, both directions.
        pos_x = posx_ref[...]
        pos_y = posy_ref[...]
        slab = slab_ref[...]
        gtx = slab[:, 2 * K:3 * K]
        gty = slab[:, 3 * K:4 * K]
        dxa = pos_x[:, :, None] - gtx[:, None, :]
        dya = pos_y[:, :, None] - gty[:, None, :]
        sq = dxa * dxa + dya * dya                             # (BT, K, K)
        h_ab = jnp.mean(jnp.sqrt(jnp.min(sq, axis=2)), axis=1, keepdims=True)
        h_ba = jnp.mean(jnp.sqrt(jnp.min(sq, axis=1)), axis=1, keepdims=True)
        hdist = 0.5 * (h_ab + h_ba)                            # (BT, 1)

        # last-point squared error (sum over the two coordinates)
        lxv = slab[:, 4 * K:4 * K + 1]
        lyv = slab[:, 4 * K + 1:4 * K + 2]
        dlx = pos_x[:, K - 1:K] - lxv
        dly = pos_y[:, K - 1:K] - lyv
        lastsq = dlx * dlx + dly * dly                         # (BT, 1)

        # lane-dense 128-wide stats slab: [hausdorff, collision, last_sq, 0..]
        lane = lax.broadcasted_iota(jnp.int32, stats_ref.shape, 1)
        stats_ref[...] = jnp.where(
            lane == 0, hdist,
            jnp.where(lane == 1, coll,
                      jnp.where(lane == 2, lastsq, 0.0)))


# ----------------------------- wrapper ---------------------------------------
def _round_up(x, m):
    return ((x + m - 1) // m) * m


def loss_evaluation(output_dict, cfg=CFG):
    y_hat = output_dict["y_hat"].astype(jnp.float32)          # (B, K, 2)
    y_gt = output_dict["path"].astype(jnp.float32)            # (B, K, 2)
    y_last = output_dict["last_poses"].astype(jnp.float32)    # (B, 2)
    local_map = output_dict["png"].astype(jnp.float32)        # (B, W, H)
    mu = output_dict["mu"].astype(jnp.float32)                # (B, Z)
    logvar = output_dict["logvar"].astype(jnp.float32)        # (B, Z)

    B, K, D = y_hat.shape
    _, W, H = local_map.shape
    P = W * H

    # Batch tile 128 for production batches (review #1), clamped to the padded
    # batch so tiny batches don't pay 64x padded compute.  PT=2048 keeps the
    # per-step working set (csq scratch + occ double-buffer + temporaries)
    # under ~10 MiB -> safe on v7x (64 MiB VMEM); v5e/v6e with B >= 256 can use
    # BT=256 / PT=4096 with vmem_limit ~96 MiB for slightly better amortization.
    BT = min(128, _round_up(B, 8))
    B_pad = _round_up(B, BT)
    PT = min(2048, _round_up(P, 128))
    P_pad = _round_up(P, PT)

    # ---- glue: lane-dense re-layout + precomputed constants -----------------
    SLAB_W = max(128, _round_up(4 * K + 2, 128))
    slab = jnp.zeros((B_pad, SLAB_W), jnp.float32)
    slab = slab.at[:B, 0:K].set(y_hat[:, :, 0])
    slab = slab.at[:B, K:2 * K].set(y_hat[:, :, 1])
    slab = slab.at[:B, 2 * K:3 * K].set(y_gt[:, :, 0])
    slab = slab.at[:B, 3 * K:4 * K].set(y_gt[:, :, 1])
    slab = slab.at[:B, 4 * K].set(y_last[:, 0])
    slab = slab.at[:B, 4 * K + 1].set(y_last[:, 1])

    # scaled cumsum matrix: tri[j, k] = scale if j <= k else 0
    jj = jnp.arange(K, dtype=jnp.int32)
    tri = jnp.where(jj[:, None] <= jj[None, :],
                    jnp.float32(cfg.scale_waypoints), jnp.float32(0.0))

    # pixel coordinate rows + shared r^2+c^2 row (row-major flattened (W,H) map)
    idx = jnp.arange(P, dtype=jnp.int32)
    rowc = (idx // H).astype(jnp.float32)
    colc = (idx % H).astype(jnp.float32)
    coords = jnp.zeros((8, P_pad), jnp.float32)
    coords = coords.at[0, :P].set(rowc)
    coords = coords.at[1, :P].set(colc)
    coords = coords.at[2, :P].set(rowc * rowc + colc * colc)

    # occupancy as int8 (4x fewer HBM bytes than the old f32 bias stream)
    occ = jnp.zeros((B_pad, P_pad), jnp.int8)
    occ = occ.at[:B, :P].set((local_map.reshape(B, P) > 0.0).astype(jnp.int8))

    kernel = functools.partial(
        _loss_kernel,
        inv_res=float(1.0 / cfg.local_map_resolution),
        res=float(cfg.local_map_resolution),
        map_thresh=float(cfg.local_map_threshold),
        K=K,
    )

    grid = (B_pad // BT, P_pad // PT)   # (batch tiles, pixel chunks) -- keep order

    stats = pl.pallas_call(
        kernel,
        out_shape=jax.ShapeDtypeStruct((B_pad, 128), jnp.float32),
        grid=grid,
        in_specs=[
            pl.BlockSpec((BT, SLAB_W), lambda i, p: (i, 0)),   # merged row slab
            pl.BlockSpec((K, K), lambda i, p: (0, 0)),         # scaled tri matrix
            pl.BlockSpec((8, PT), lambda i, p: (0, p)),        # row / col / r^2+c^2
            pl.BlockSpec((BT, PT), lambda i, p: (i, p)),       # occupancy (int8)
        ],
        out_specs=pl.BlockSpec((BT, 128), lambda i, p: (i, 0)),
        scratch_shapes=[
            pltpu.VMEM((BT, K), jnp.float32),   # pos_x
            pltpu.VMEM((BT, K), jnp.float32),   # pos_y
            pltpu.VMEM((BT, K), jnp.float32),   # -2 * px
            pltpu.VMEM((BT, K), jnp.float32),   # -2 * py
            pltpu.VMEM((BT, K), jnp.float32),   # px^2 + py^2
            pltpu.VMEM((BT, K), jnp.float32),   # running min
            pltpu.VMEM((BT, PT), jnp.float32),  # occupancy-masked r^2+c^2
        ],
        compiler_params=pltpu.CompilerParams(
            dimension_semantics=("parallel", "arbitrary"),
            vmem_limit_bytes=48 * 1024 * 1024),
    )(slab, tri, coords, occ)

    dist_b = stats[:B, 0]
    coll_b = stats[:B, 1]
    lastsq_b = stats[:B, 2]

    distance_loss = jnp.mean(dist_b)
    last_point_loss = jnp.sum(lastsq_b) / (B * D)      # nn.MSELoss(mean) over B*D
    collision_mean = jnp.mean(coll_b)
    collision_max = jnp.max(coll_b)
    # Trivial elementwise+reduce with no data sharing with the kernel -> glue.
    kld_loss = -0.5 * jnp.sum(1.0 + logvar - mu * mu - jnp.exp(logvar)) / B

    loss = (cfg.last_ratio * last_point_loss
            + cfg.vae_kld_ratio * kld_loss
            + cfg.distance_ratio * distance_loss
            + cfg.collision_mean_ratio * collision_mean
            + cfg.collision_max_ratio * collision_max)

    return {
        "loss": loss,
        "last_point_loss": last_point_loss,
        "vae_kld_loss": kld_loss,
        "distance_loss": distance_loss,
        "collision_loss_mean": collision_mean,
        "collision_loss_max": collision_max,
    }


# ----------------------------- demo -------------------------------------------
if __name__ == "__main__":
    B, K, D = 2, 8, 2
    W = H = 16
    Z = 4

    key = jax.random.PRNGKey(0)
    k1, k2, k3, k4, k5, k6 = jax.random.split(key, 6)

    y_hat = 0.1 * jax.random.normal(k1, (B, K, D), dtype=jnp.float32)
    y_gt = 0.1 * jax.random.normal(k2, (B, K, D), dtype=jnp.float32)
    y_last = 0.1 * jax.random.normal(k3, (B, D), dtype=jnp.float32)
    # occupancy map with ~20% positive pixels; force at least one occupied pixel
    # per batch (the torch reference assumes non-empty maps).
    local_map = (jax.random.uniform(k4, (B, W, H)) > 0.8).astype(jnp.float32)
    local_map = local_map.at[:, 3, 4].set(1.0)
    mu = jax.random.normal(k5, (B, Z), dtype=jnp.float32)
    logvar = 0.1 * jax.random.normal(k6, (B, Z), dtype=jnp.float32)

    output_dict = {
        "path": y_gt,
        "last_poses": y_last,
        "y_hat": y_hat,
        "png": local_map,
        "mu": mu,
        "logvar": logvar,
    }

    loss_dict = loss_evaluation(output_dict)
    loss_dict = jax.tree_util.tree_map(jax.block_until_ready, loss_dict)
    print("KERNEL_OK")
</pallas_src>

<mosaic_0001>
module attributes {stable_mosaic.version = 11 : i64} {
  func.func @_loss_kernel(%arg0: i32, %arg1: i32, %arg2: memref<8x128xf32, #tpu.memory_space<vmem>>, %arg3: memref<8x8xf32, #tpu.memory_space<vmem>>, %arg4: memref<8x256xf32, #tpu.memory_space<vmem>>, %arg5: memref<8x256xi8, #tpu.memory_space<vmem>>, %arg6: memref<8x128xf32, #tpu.memory_space<vmem>>, %arg7: memref<8x8xf32, #tpu.memory_space<vmem>>, %arg8: memref<8x8xf32, #tpu.memory_space<vmem>>, %arg9: memref<8x8xf32, #tpu.memory_space<vmem>>, %arg10: memref<8x8xf32, #tpu.memory_space<vmem>>, %arg11: memref<8x8xf32, #tpu.memory_space<vmem>>, %arg12: memref<8x8xf32, #tpu.memory_space<vmem>>, %arg13: memref<8x256xf32, #tpu.memory_space<vmem>>) attributes {dimension_semantics = [#tpu.dimension_semantics<parallel>, #tpu.dimension_semantics<arbitrary>], iteration_bounds = array<i64: 1, 1>, scalar_prefetch = 0 : i64, scratch_operands = 7 : i64, tpu.core_type = #tpu.core_type<tc>, window_params = [{transform_indices = @transform_0, window_bounds = array<i64: 8, 128>}, {pipeline_mode = #tpu.pipeline_mode<synchronous>, transform_indices = @transform_1, window_bounds = array<i64: 8, 8>}, {transform_indices = @transform_2, window_bounds = array<i64: 8, 256>}, {transform_indices = @transform_3, window_bounds = array<i64: 8, 256>}, {transform_indices = @transform_4, window_bounds = array<i64: 8, 128>}]} {
    %c0_i32 = arith.constant 0 : i32
    %0 = arith.cmpi eq, %arg1, %c0_i32 : i32
    %1 = arith.extui %0 : i1 to i32
    %c0_i32_0 = arith.constant 0 : i32
    %2 = arith.cmpi ne, %1, %c0_i32_0 : i32
    scf.if %2 {
      %c0_43 = arith.constant 0 : index
      %c0_44 = arith.constant 0 : index
      %128 = vector.load %arg2[%c0_43, %c0_44] : memref<8x128xf32, #tpu.memory_space<vmem>>, vector<8x128xf32>
      %129 = vector.extract_strided_slice %128 {offsets = [0, 0], sizes = [8, 8], strides = [1, 1]} : vector<8x128xf32> to vector<8x8xf32>
      %130 = vector.extract_strided_slice %128 {offsets = [0, 8], sizes = [8, 8], strides = [1, 1]} : vector<8x128xf32> to vector<8x8xf32>
      %c0_45 = arith.constant 0 : index
      %c0_46 = arith.constant 0 : index
      %131 = vector.load %arg3[%c0_45, %c0_46] : memref<8x8xf32, #tpu.memory_space<vmem>>, vector<8x8xf32>
      %cst_47 = arith.constant dense<0.000000e+00> : vector<8x8xf32>
      %132 = tpu.matmul %129, %131, %cst_47 {dimension_numbers = #tpu.dot_dimension_numbers<[1], [0], [0], [1], [0, 0, 1, 1], [], []>} : vector<8x8xf32>, vector<8x8xf32>, vector<8x8xf32> -> vector<8x8xf32>
      %cst_48 = arith.constant dense<0.000000e+00> : vector<8x8xf32>
      %133 = tpu.matmul %130, %131, %cst_48 {dimension_numbers = #tpu.dot_dimension_numbers<[1], [0], [0], [1], [0, 0, 1, 1], [], []>} : vector<8x8xf32>, vector<8x8xf32>, vector<8x8xf32> -> vector<8x8xf32>
      %cst_49 = arith.constant 1.000000e+01 : f32
      %134 = vector.broadcast %cst_49 : f32 to vector<8x8xf32>
      %135 = arith.mulf %132, %134 : vector<8x8xf32>
      %cst_50 = arith.constant 8.000000e+00 : f32
      %136 = vector.broadcast %cst_50 : f32 to vector<8x8xf32>
      %137 = arith.addf %135, %136 : vector<8x8xf32>
      %cst_51 = arith.constant 1.000000e+01 : f32
      %138 = vector.broadcast %cst_51 : f32 to vector<8x8xf32>
      %139 = arith.mulf %133, %138 : vector<8x8xf32>
      %cst_52 = arith.constant 8.000000e+00 : f32
      %140 = vector.broadcast %cst_52 : f32 to vector<8x8xf32>
      %141 = arith.addf %139, %140 : vector<8x8xf32>
      %cst_53 = arith.constant 0.000000e+00 : f32
      %142 = vector.broadcast %cst_53 : f32 to vector<8x8xf32>
      %143 = arith.cmpf oge, %137, %142 : vector<8x8xf32>
      %144 = math.floor %137 : vector<8x8xf32>
      %145 = math.ceil %137 : vector<8x8xf32>
      %146 = arith.select %143, %144, %145 : vector<8x8xi1>, vector<8x8xf32>
      %cst_54 = arith.constant 0.000000e+00 : f32
      %147 = vector.broadcast %cst_54 : f32 to vector<8x8xf32>
      %148 = arith.cmpf oge, %141, %147 : vector<8x8xf32>
      %149 = math.floor %141 : vector<8x8xf32>
      %150 = math.ceil %141 : vector<8x8xf32>
      %151 = arith.select %148, %149, %150 : vector<8x8xi1>, vector<8x8xf32>
      %c0_55 = arith.constant 0 : index
      %c0_56 = arith.constant 0 : index
      %152 = vector.load %arg7[%c0_55, %c0_56] : memref<8x8xf32, #tpu.memory_space<vmem>>, vector<8x8xf32>
      tpu.vector_store %arg7[%c0_55, %c0_56], %132 {strides = array<i32>} : memref<8x8xf32, #tpu.memory_space<vmem>>, vector<8x8xf32>,
      %c0_57 = arith.constant 0 : index
      %c0_58 = arith.constant 0 : index
      %153 = vector.load %arg8[%c0_57, %c0_58] : memref<8x8xf32, #tpu.memory_space<vmem>>, vector<8x8xf32>
      tpu.vector_store %arg8[%c0_57, %c0_58], %133 {strides = array<i32>} : memref<8x8xf32, #tpu.memory_space<vmem>>, vector<8x8xf32>,
      %cst_59 = arith.constant -2.000000e+00 : f32
      %154 = vector.broadcast %cst_59 : f32 to vector<8x8xf32>
      %155 = arith.mulf %154, %146 : vector<8x8xf32>
      %c0_60 = arith.constant 0 : index
      %c0_61 = arith.constant 0 : index
      %156 = vector.load %arg9[%c0_60, %c0_61] : memref<8x8xf32, #tpu.memory_space<vmem>>, vector<8x8xf32>
      tpu.vector_store %arg9[%c0_60, %c0_61], %155 {strides = array<i32>} : memref<8x8xf32, #tpu.memory_space<vmem>>, vector<8x8xf32>,
      %cst_62 = arith.constant -2.000000e+00 : f32
      %157 = vector.broadcast %cst_62 : f32 to vector<8x8xf32>
      %158 = arith.mulf %157, %151 : vector<8x8xf32>
      %c0_63 = arith.constant 0 : index
      %c0_64 = arith.constant 0 : index
      %159 = vector.load %arg10[%c0_63, %c0_64] : memref<8x8xf32, #tpu.memory_space<vmem>>, vector<8x8xf32>
      tpu.vector_store %arg10[%c0_63, %c0_64], %158 {strides = array<i32>} : memref<8x8xf32, #tpu.memory_space<vmem>>, vector<8x8xf32>,
      %160 = arith.mulf %146, %146 : vector<8x8xf32>
      %161 = arith.mulf %151, %151 : vector<8x8xf32>
      %162 = arith.addf %160, %161 : vector<8x8xf32>
      %c0_65 = arith.constant 0 : index
      %c0_66 = arith.constant 0 : index
      %163 = vector.load %arg11[%c0_65, %c0_66] : memref<8x8xf32, #tpu.memory_space<vmem>>, vector<8x8xf32>
      tpu.vector_store %arg11[%c0_65, %c0_66], %162 {strides = array<i32>} : memref<8x8xf32, #tpu.memory_space<vmem>>, vector<8x8xf32>,
      %cst_67 = arith.constant 1.000000e+30 : f32
      %164 = vector.broadcast %cst_67 : f32 to vector<8x8xf32>
      %c0_68 = arith.constant 0 : index
      %c0_69 = arith.constant 0 : index
      %165 = vector.load %arg12[%c0_68, %c0_69] : memref<8x8xf32, #tpu.memory_space<vmem>>, vector<8x8xf32>
      tpu.vector_store %arg12[%c0_68, %c0_69], %164 {strides = array<i32>} : memref<8x8xf32, #tpu.memory_space<vmem>>, vector<8x8xf32>,
    } else {
    }
    %c0 = arith.constant 0 : index
    %c0_1 = arith.constant 0 : index
    %3 = vector.load %arg4[%c0, %c0_1] : memref<8x256xf32, #tpu.memory_space<vmem>>, vector<1x256xf32>
    %c1 = arith.constant 1 : index
    %c0_2 = arith.constant 0 : index
    %4 = vector.load %arg4[%c1, %c0_2] : memref<8x256xf32, #tpu.memory_space<vmem>>, vector<1x256xf32>
    %c2 = arith.constant 2 : index
    %c0_3 = arith.constant 0 : index
    %5 = vector.load %arg4[%c2, %c0_3] : memref<8x256xf32, #tpu.memory_space<vmem>>, vector<1x256xf32>
    %c0_4 = arith.constant 0 : index
    %c0_5 = arith.constant 0 : index
    %6 = vector.load %arg5[%c0_4, %c0_5] : memref<8x256xi8, #tpu.memory_space<vmem>>, vector<8x256xi8>
    %7 = arith.sitofp %6 : vector<8x256xi8> to vector<8x256xf32>
    %cst = arith.constant 0.000000e+00 : f32
    %8 = vector.broadcast %cst : f32 to vector<8x256xf32>
    %9 = arith.cmpf ogt, %7, %8 : vector<8x256xf32>
    %cst_6 = arith.constant 1.000000e+30 : f32
    %10 = vector.shape_cast %5 : vector<1x256xf32> to vector<1x256xf32>
    %11 = vector.broadcast %10 : vector<1x256xf32> to vector<8x256xf32>
    %12 = vector.broadcast %cst_6 : f32 to vector<8x256xf32>
    %13 = arith.select %9, %11, %12 : vector<8x256xi1>, vector<8x256xf32>
    %c0_7 = arith.constant 0 : index
    %c0_8 = arith.constant 0 : index
    %14 = vector.load %arg13[%c0_7, %c0_8] : memref<8x256xf32, #tpu.memory_space<vmem>>, vector<8x256xf32>
    tpu.vector_store %arg13[%c0_7, %c0_8], %13 {strides = array<i32>} : memref<8x256xf32, #tpu.memory_space<vmem>>, vector<8x256xf32>,
    %c0_9 = arith.constant 0 : index
    %c0_10 = arith.constant 0 : index
    %15 = vector.load %arg9[%c0_9, %c0_10] : memref<8x8xf32, #tpu.memory_space<vmem>>, vector<8x8xf32>
    %c0_11 = arith.constant 0 : index
    %c0_12 = arith.constant 0 : index
    %16 = vector.load %arg10[%c0_11, %c0_12] : memref<8x8xf32, #tpu.memory_space<vmem>>, vector<8x8xf32>
    %17 = vector.extract_strided_slice %15 {offsets = [0, 0], sizes = [8, 1], strides = [1, 1]} : vector<8x8xf32> to vector<8x1xf32>
    %18 = vector.broadcast %17 : vector<8x1xf32> to vector<8x256xf32>
    %19 = vector.broadcast %3 : vector<1x256xf32> to vector<8x256xf32>
    %20 = arith.mulf %18, %19 : vector<8x256xf32>
    %21 = vector.extract_strided_slice %16 {offsets = [0, 0], sizes = [8, 1], strides = [1, 1]} : vector<8x8xf32> to vector<8x1xf32>
    %22 = vector.broadcast %21 : vector<8x1xf32> to vector<8x256xf32>
    %23 = vector.broadcast %4 : vector<1x256xf32> to vector<8x256xf32>
    %24 = arith.mulf %22, %23 : vector<8x256xf32>
    %25 = arith.addf %20, %24 : vector<8x256xf32>
    %c0_13 = arith.constant 0 : index
    %c0_14 = arith.constant 0 : index
    %26 = vector.load %arg13[%c0_13, %c0_14] : memref<8x256xf32, #tpu.memory_space<vmem>>, vector<8x256xf32>
    %27 = arith.addf %25, %26 : vector<8x256xf32>
    %cst_15 = arith.constant dense<0x7F800000> : vector<8xf32>
    %28 = vector.multi_reduction <minimumf>, %27, %cst_15 [1] : vector<8x256xf32> to vector<8xf32>
    %29 = vector.shape_cast %28 : vector<8xf32> to vector<8x1xf32>
    %30 = vector.extract_strided_slice %15 {offsets = [0, 1], sizes = [8, 1], strides = [1, 1]} : vector<8x8xf32> to vector<8x1xf32>
    %31 = vector.broadcast %30 : vector<8x1xf32> to vector<8x256xf32>
    %32 = vector.broadcast %3 : vector<1x256xf32> to vector<8x256xf32>
    %33 = arith.mulf %31, %32 : vector<8x256xf32>
    %34 = vector.extract_strided_slice %16 {offsets = [0, 1], sizes = [8, 1], strides = [1, 1]} : vector<8x8xf32> to vector<8x1xf32>
    %35 = vector.broadcast %34 : vector<8x1xf32> to vector<8x256xf32>
    %36 = vector.broadcast %4 : vector<1x256xf32> to vector<8x256xf32>
    %37 = arith.mulf %35, %36 : vector<8x256xf32>
    %38 = arith.addf %33, %37 : vector<8x256xf32>
    %c0_16 = arith.constant 0 : index
    %c0_17 = arith.constant 0 : index
    %39 = vector.load %arg13[%c0_16, %c0_17] : memref<8x256xf32, #tpu.memory_space<vmem>>, vector<8x256xf32>
    %40 = arith.addf %38, %39 : vector<8x256xf32>
    %cst_18 = arith.constant dense<0x7F800000> : vector<8xf32>
    %41 = vector.multi_reduction <minimumf>, %40, %cst_18 [1] : vector<8x256xf32> to vector<8xf32>
    %42 = vector.shape_cast %41 : vector<8xf32> to vector<8x1xf32>
    %43 = vector.extract_strided_slice %15 {offsets = [0, 2], sizes = [8, 1], strides = [1, 1]} : vector<8x8xf32> to vector<8x1xf32>
    %44 = vector.broadcast %43 : vector<8x1xf32> to vector<8x256xf32>
    %45 = vector.broadcast %3 : vector<1x256xf32> to vector<8x256xf32>
    %46 = arith.mulf %44, %45 : vector<8x256xf32>
    %47 = vector.extract_strided_slice %16 {offsets = [0, 2], sizes = [8, 1], strides = [1, 1]} : vector<8x8xf32> to vector<8x1xf32>
    %48 = vector.broadcast %47 : vector<8x1xf32> to vector<8x256xf32>
    %49 = vector.broadcast %4 : vector<1x256xf32> to vector<8x256xf32>
    %50 = arith.mulf %48, %49 : vector<8x256xf32>
    %51 = arith.addf %46, %50 : vector<8x256xf32>
    %c0_19 = arith.constant 0 : index
    %c0_20 = arith.constant 0 : index
    %52 = vector.load %arg13[%c0_19, %c0_20] : memref<8x256xf32, #tpu.memory_space<vmem>>, vector<8x256xf32>
    %53 = arith.addf %51, %52 : vector<8x256xf32>
    %cst_21 = arith.constant dense<0x7F800000> : vector<8xf32>
    %54 = vector.multi_reduction <minimumf>, %53, %cst_21 [1] : vector<8x256xf32> to vector<8xf32>
    %55 = vector.shape_cast %54 : vector<8xf32> to vector<8x1xf32>
    %56 = vector.extract_strided_slice %15 {offsets = [0, 3], sizes = [8, 1], strides = [1, 1]} : vector<8x8xf32> to vector<8x1xf32>
    %57 = vector.broadcast %56 : vector<8x1xf32> to vector<8x256xf32>
    %58 = vector.broadcast %3 : vector<1x256xf32> to vector<8x256xf32>
    %59 = arith.mulf %57, %58 : vector<8x256xf32>
    %60 = vector.extract_strided_slice %16 {offsets = [0, 3], sizes = [8, 1], strides = [1, 1]} : vector<8x8xf32> to vector<8x1xf32>
    %61 = vector.broadcast %60 : vector<8x1xf32> to vector<8x256xf32>
    %62 = vector.broadcast %4 : vector<1x256xf32> to vector<8x256xf32>
    %63 = arith.mulf %61, %62 : vector<8x256xf32>
    %64 = arith.addf %59, %63 : vector<8x256xf32>
    %c0_22 = arith.constant 0 : index
    %c0_23 = arith.constant 0 : index
    %65 = vector.load %arg13[%c0_22, %c0_23] : memref<8x256xf32, #tpu.memory_space<vmem>>, vector<8x256xf32>
    %66 = arith.addf %64, %65 : vector<8x256xf32>
    %cst_24 = arith.constant dense<0x7F800000> : vector<8xf32>
    %67 = vector.multi_reduction <minimumf>, %66, %cst_24 [1] : vector<8x256xf32> to vector<8xf32>
    %68 = vector.shape_cast %67 : vector<8xf32> to vector<8x1xf32>
    %69 = vector.extract_strided_slice %15 {offsets = [0, 4], sizes = [8, 1], strides = [1, 1]} : vector<8x8xf32> to vector<8x1xf32>
    %70 = vector.broadcast %69 : vector<8x1xf32> to vector<8x256xf32>
    %71 = vector.broadcast %3 : vector<1x256xf32> to vector<8x256xf32>
    %72 = arith.mulf %70, %71 : vector<8x256xf32>
    %73 = vector.extract_strided_slice %16 {offsets = [0, 4], sizes = [8, 1], strides = [1, 1]} : vector<8x8xf32> to vector<8x1xf32>
    %74 = vector.broadcast %73 : vector<8x1xf32> to vector<8x256xf32>
    %75 = vector.broadcast %4 : vector<1x256xf32> to vector<8x256xf32>
    %76 = arith.mulf %74, %75 : vector<8x256xf32>
    %77 = arith.addf %72, %76 : vector<8x256xf32>
    %c0_25 = arith.constant 0 : index
    %c0_26 = arith.constant 0 : index
    %78 = vector.load %arg13[%c0_25, %c0_26] : memref<8x256xf32, #tpu.memory_space<vmem>>, vector<8x256xf32>
    %79 = arith.addf %77, %78 : vector<8x256xf32>
    %cst_27 = arith.constant dense<0x7F800000> : vector<8xf32>
    %80 = vector.multi_reduction <minimumf>, %79, %cst_27 [1] : vector<8x256xf32> to vector<8xf32>
    %81 = vector.shape_cast %80 : vector<8xf32> to vector<8x1xf32>
    %82 = vector.extract_strided_slice %15 {offsets = [0, 5], sizes = [8, 1], strides = [1, 1]} : vector<8x8xf32> to vector<8x1xf32>
    %83 = vector.broadcast %82 : vector<8x1xf32> to vector<8x256xf32>
    %84 = vector.broadcast %3 : vector<1x256xf32> to vector<8x256xf32>
    %85 = arith.mulf %83, %84 : vector<8x256xf32>
    %86 = vector.extract_strided_slice %16 {offsets = [0, 5], sizes = [8, 1], strides = [1, 1]} : vector<8x8xf32> to vector<8x1xf32>
    %87 = vector.broadcast %86 : vector<8x1xf32> to vector<8x256xf32>
    %88 = vector.broadcast %4 : vector<1x256xf32> to vector<8x256xf32>
    %89 = arith.mulf %87, %88 : vector<8x256xf32>
    %90 = arith.addf %85, %89 : vector<8x256xf32>
    %c0_28 = arith.constant 0 : index
    %c0_29 = arith.constant 0 : index
    %91 = vector.load %arg13[%c0_28, %c0_29] : memref<8x256xf32, #tpu.memory_space<vmem>>, vector<8x256xf32>
    %92 = arith.addf %90, %91 : vector<8x256xf32>
    %cst_30 = arith.constant dense<0x7F800000> : vector<8xf32>
    %93 = vector.multi_reduction <minimumf>, %92, %cst_30 [1] : vector<8x256xf32> to vector<8xf32>
    %94 = vector.shape_cast %93 : vector<8xf32> to vector<8x1xf32>
    %95 = vector.extract_strided_slice %15 {offsets = [0, 6], sizes = [8, 1], strides = [1, 1]} : vector<8x8xf32> to vector<8x1xf32>
    %96 = vector.broadcast %95 : vector<8x1xf32> to vector<8x256xf32>
    %97 = vector.broadcast %3 : vector<1x256xf32> to vector<8x256xf32>
    %98 = arith.mulf %96, %97 : vector<8x256xf32>
    %99 = vector.extract_strided_slice %16 {offsets = [0, 6], sizes = [8, 1], strides = [1, 1]} : vector<8x8xf32> to vector<8x1xf32>
    %100 = vector.broadcast %99 : vector<8x1xf32> to vector<8x256xf32>
    %101 = vector.broadcast %4 : vector<1x256xf32> to vector<8x256xf32>
    %102 = arith.mulf %100, %101 : vector<8x256xf32>
    %103 = arith.addf %98, %102 : vector<8x256xf32>
    %c0_31 = arith.constant 0 : index
    %c0_32 = arith.constant 0 : index
    %104 = vector.load %arg13[%c0_31, %c0_32] : memref<8x256xf32, #tpu.memory_space<vmem>>, vector<8x256xf32>
    %105 = arith.addf %103, %104 : vector<8x256xf32>
    %cst_33 = arith.constant dense<0x7F800000> : vector<8xf32>
    %106 = vector.multi_reduction <minimumf>, %105, %cst_33 [1] : vector<8x256xf32> to vector<8xf32>
    %107 = vector.shape_cast %106 : vector<8xf32> to vector<8x1xf32>
    %108 = vector.extract_strided_slice %15 {offsets = [0, 7], sizes = [8, 1], strides = [1, 1]} : vector<8x8xf32> to vector<8x1xf32>
    %109 = vector.broadcast %108 : vector<8x1xf32> to vector<8x256xf32>
    %110 = vector.broadcast %3 : vector<1x256xf32> to vector<8x256xf32>
    %111 = arith.mulf %109, %110 : vector<8x256xf32>
    %112 = vector.extract_strided_slice %16 {offsets = [0, 7], sizes = [8, 1], strides = [1, 1]} : vector<8x8xf32> to vector<8x1xf32>
    %113 = vector.broadcast %112 : vector<8x1xf32> to vector<8x256xf32>
    %114 = vector.broadcast %4 : vector<1x256xf32> to vector<8x256xf32>
    %115 = arith.mulf %113, %114 : vector<8x256xf32>
    %116 = arith.addf %111, %115 : vector<8x256xf32>
    %c0_34 = arith.constant 0 : index
    %c0_35 = arith.constant 0 : index
    %117 = vector.load %arg13[%c0_34, %c0_35] : memref<8x256xf32, #tpu.memory_space<vmem>>, vector<8x256xf32>
    %118 = arith.addf %116, %117 : vector<8x256xf32>
    %cst_36 = arith.constant dense<0x7F800000> : vector<8xf32>
    %119 = vector.multi_reduction <minimumf>, %118, %cst_36 [1] : vector<8x256xf32> to vector<8xf32>
    %120 = vector.shape_cast %119 : vector<8xf32> to vector<8x1xf32>
    %c0_37 = arith.constant 0 : index
    %c0_38 = arith.constant 0 : index
    %121 = vector.load %arg12[%c0_37, %c0_38] : memref<8x8xf32, #tpu.memory_space<vmem>>, vector<8x8xf32>
    %122 = tpu.concatenate %29, %42, %55, %68, %81, %94, %107, %120 in 1 : vector<8x1xf32>, vector<8x1xf32>, vector<8x1xf32>, vector<8x1xf32>, vector<8x1xf32>, vector<8x1xf32>, vector<8x1xf32>, vector<8x1xf32> -> vector<8x8xf32>
    %123 = arith.minimumf %121, %122 : vector<8x8xf32>
    %c0_39 = arith.constant 0 : index
    %c0_40 = arith.constant 0 : index
    %124 = vector.load %arg12[%c0_39, %c0_40] : memref<8x8xf32, #tpu.memory_space<vmem>>, vector<8x8xf32>
    tpu.vector_store %arg12[%c0_39, %c0_40], %123 {strides = array<i32>} : memref<8x8xf32, #tpu.memory_space<vmem>>, vector<8x8xf32>,
    %c0_i32_41 = arith.constant 0 : i32
    %125 = arith.cmpi eq, %arg1, %c0_i32_41 : i32
    %126 = arith.extui %125 : i1 to i32
    %c0_i32_42 = arith.constant 0 : i32
    %127 = arith.cmpi ne, %126, %c0_i32_42 : i32
    scf.if %127 {
      %c0_43 = arith.constant 0 : index
      %c0_44 = arith.constant 0 : index
      %128 = vector.load %arg12[%c0_43, %c0_44] : memref<8x8xf32, #tpu.memory_space<vmem>>, vector<8x8xf32>
      %c0_45 = arith.constant 0 : index
      %c0_46 = arith.constant 0 : index
      %129 = vector.load %arg11[%c0_45, %c0_46] : memref<8x8xf32, #tpu.memory_space<vmem>>, vector<8x8xf32>
      %130 = arith.addf %128, %129 : vector<8x8xf32>
      %cst_47 = arith.constant 0.000000e+00 : f32
      %131 = vector.broadcast %cst_47 : f32 to vector<8x8xf32>
      %132 = arith.maximumf %130, %131 : vector<8x8xf32>
      %133 = math.sqrt %132 : vector<8x8xf32>
      %cst_48 = arith.constant 1.000000e-01 : f32
      %134 = vector.broadcast %cst_48 : f32 to vector<8x8xf32>
      %135 = arith.mulf %133, %134 : vector<8x8xf32>
      %cst_49 = arith.constant 9.99999974E-5 : f32
      %cst_50 = arith.constant 9.990000e-01 : f32
      %136 = vector.broadcast %cst_49 : f32 to vector<8x8xf32>
      %137 = arith.maximumf %136, %135 : vector<8x8xf32>
      %138 = vector.broadcast %cst_50 : f32 to vector<8x8xf32>
      %139 = arith.minimumf %138, %137 : vector<8x8xf32>
      %cst_51 = arith.constant 1.000000e+00 : f32
      %140 = vector.broadcast %cst_51 : f32 to vector<8x8xf32>
      %141 = arith.subf %140, %139 : vector<8x8xf32>
      %cst_52 = arith.constant 1.000000e+00 : f32
      %142 = vector.broadcast %cst_52 : f32 to vector<8x8xf32>
      %143 = arith.addf %142, %141 : vector<8x8xf32>
      %cst_53 = arith.constant 1.000000e+00 : f32
      %144 = vector.broadcast %cst_53 : f32 to vector<8x8xf32>
      %145 = arith.subf %144, %141 : vector<8x8xf32>
      %146 = arith.divf %143, %145 : vector<8x8xf32>
      %147 = math.log %146 : vector<8x8xf32>
      %cst_54 = arith.constant 5.000000e-01 : f32
      %148 = vector.broadcast %cst_54 : f32 to vector<8x8xf32>
      %149 = arith.mulf %148, %147 : vector<8x8xf32>
      %cst_55 = arith.constant dense<0.000000e+00> : vector<8xf32>
      %150 = vector.multi_reduction <add>, %149, %cst_55 [1] : vector<8x8xf32> to vector<8xf32>
      %151 = vector.shape_cast %150 : vector<8xf32> to vector<8x1xf32>
      %cst_56 = arith.constant 8.000000e+00 : f32
      %152 = vector.broadcast %cst_56 : f32 to vector<8x1xf32>
      %153 = arith.divf %151, %152 : vector<8x1xf32>
      %c0_57 = arith.constant 0 : index
      %c0_58 = arith.constant 0 : index
      %154 = vector.load %arg7[%c0_57, %c0_58] : memref<8x8xf32, #tpu.memory_space<vmem>>, vector<8x8xf32>
      %c0_59 = arith.constant 0 : index
      %c0_60 = arith.constant 0 : index
      %155 = vector.load %arg8[%c0_59, %c0_60] : memref<8x8xf32, #tpu.memory_space<vmem>>, vector<8x8xf32>
      %c0_61 = arith.constant 0 : index
      %c0_62 = arith.constant 0 : index
      %156 = vector.load %arg2[%c0_61, %c0_62] : memref<8x128xf32, #tpu.memory_space<vmem>>, vector<8x128xf32>
      %157 = vector.extract_strided_slice %156 {offsets = [0, 16], sizes = [8, 8], strides = [1, 1]} : vector<8x128xf32> to vector<8x8xf32>
      %158 = vector.extract_strided_slice %156 {offsets = [0, 24], sizes = [8, 8], strides = [1, 1]} : vector<8x128xf32> to vector<8x8xf32>
      %159 = vector.shape_cast %154 : vector<8x8xf32> to vector<8x8x1xf32>
      %160 = vector.shape_cast %157 : vector<8x8xf32> to vector<8x1x8xf32>
      %161 = vector.broadcast %159 : vector<8x8x1xf32> to vector<8x8x8xf32>
      %162 = vector.broadcast %160 : vector<8x1x8xf32> to vector<8x8x8xf32>
      %163 = arith.subf %161, %162 : vector<8x8x8xf32>
      %164 = vector.shape_cast %155 : vector<8x8xf32> to vector<8x8x1xf32>
      %165 = vector.shape_cast %158 : vector<8x8xf32> to vector<8x1x8xf32>
      %166 = vector.broadcast %164 : vector<8x8x1xf32> to vector<8x8x8xf32>
      %167 = vector.broadcast %165 : vector<8x1x8xf32> to vector<8x8x8xf32>
      %168 = arith.subf %166, %167 : vector<8x8x8xf32>
      %169 = arith.mulf %163, %163 : vector<8x8x8xf32>
      %170 = arith.mulf %168, %168 : vector<8x8x8xf32>
      %171 = arith.addf %169, %170 : vector<8x8x8xf32>
      %cst_63 = arith.constant dense<0x7F800000> : vector<8x8xf32>
      %172 = vector.multi_reduction <minimumf>, %171, %cst_63 [2] : vector<8x8x8xf32> to vector<8x8xf32>
      %173 = math.sqrt %172 : vector<8x8xf32>
      %cst_64 = arith.constant dense<0.000000e+00> : vector<8xf32>
      %174 = vector.multi_reduction <add>, %173, %cst_64 [1] : vector<8x8xf32> to vector<8xf32>
      %175 = vector.shape_cast %174 : vector<8xf32> to vector<8x1xf32>
      %cst_65 = arith.constant 8.000000e+00 : f32
      %176 = vector.broadcast %cst_65 : f32 to vector<8x1xf32>
      %177 = arith.divf %175, %176 : vector<8x1xf32>
      %cst_66 = arith.constant dense<0x7F800000> : vector<8x8xf32>
      %178 = vector.multi_reduction <minimumf>, %171, %cst_66 [1] : vector<8x8x8xf32> to vector<8x8xf32>
      %179 = math.sqrt %178 : vector<8x8xf32>
      %cst_67 = arith.constant dense<0.000000e+00> : vector<8xf32>
      %180 = vector.multi_reduction <add>, %179, %cst_67 [1] : vector<8x8xf32> to vector<8xf32>
      %181 = vector.shape_cast %180 : vector<8xf32> to vector<8x1xf32>
      %cst_68 = arith.constant 8.000000e+00 : f32
      %182 = vector.broadcast %cst_68 : f32 to vector<8x1xf32>
      %183 = arith.divf %181, %182 : vector<8x1xf32>
      %184 = arith.addf %177, %183 : vector<8x1xf32>
      %cst_69 = arith.constant 5.000000e-01 : f32
      %185 = vector.broadcast %cst_69 : f32 to vector<8x1xf32>
      %186 = arith.mulf %185, %184 : vector<8x1xf32>
      %187 = vector.extract_strided_slice %156 {offsets = [0, 32], sizes = [8, 1], strides = [1, 1]} : vector<8x128xf32> to vector<8x1xf32>
      %188 = vector.extract_strided_slice %156 {offsets = [0, 33], sizes = [8, 1], strides = [1, 1]} : vector<8x128xf32> to vector<8x1xf32>
      %189 = vector.extract_strided_slice %154 {offsets = [0, 7], sizes = [8, 1], strides = [1, 1]} : vector<8x8xf32> to vector<8x1xf32>
      %190 = arith.subf %189, %187 : vector<8x1xf32>
      %191 = vector.extract_strided_slice %155 {offsets = [0, 7], sizes = [8, 1], strides = [1, 1]} : vector<8x8xf32> to vector<8x1xf32>
      %192 = arith.subf %191, %188 : vector<8x1xf32>
      %193 = arith.mulf %190, %190 : vector<8x1xf32>
      %194 = arith.mulf %192, %192 : vector<8x1xf32>
      %195 = arith.addf %193, %194 : vector<8x1xf32>
      %196 = tpu.iota {dimensions = array<i32: 1>} : vector<8x128xi32>
      %c0_i32_70 = arith.constant 0 : i32
      %197 = vector.broadcast %c0_i32_70 : i32 to vector<8x128xi32>
      %198 = arith.cmpi eq, %196, %197 : vector<8x128xi32>
      %c1_i32 = arith.constant 1 : i32
      %199 = vector.broadcast %c1_i32 : i32 to vector<8x128xi32>
      %200 = arith.cmpi eq, %196, %199 : vector<8x128xi32>
      %c2_i32 = arith.constant 2 : i32
      %201 = vector.broadcast %c2_i32 : i32 to vector<8x128xi32>
      %202 = arith.cmpi eq, %196, %201 : vector<8x128xi32>
      %cst_71 = arith.constant 0.000000e+00 : f32
      %203 = vector.shape_cast %195 : vector<8x1xf32> to vector<8x1xf32>
      %204 = vector.broadcast %203 : vector<8x1xf32> to vector<8x128xf32>
      %205 = vector.broadcast %cst_71 : f32 to vector<8x128xf32>
      %206 = arith.select %202, %204, %205 : vector<8x128xi1>, vector<8x128xf32>
      %207 = vector.shape_cast %153 : vector<8x1xf32> to vector<8x1xf32>
      %208 = vector.broadcast %207 : vector<8x1xf32> to vector<8x128xf32>
      %209 = arith.select %200, %208, %206 : vector<8x128xi1>, vector<8x128xf32>
      %210 = vector.shape_cast %186 : vector<8x1xf32> to vector<8x1xf32>
      %211 = vector.broadcast %210 : vector<8x1xf32> to vector<8x128xf32>
      %212 = arith.select %198, %211, %209 : vector<8x128xi1>, vector<8x128xf32>
      %c0_72 = arith.constant 0 : index
      %c0_73 = arith.constant 0 : index
      %213 = vector.load %arg6[%c0_72, %c0_73] : memref<8x128xf32, #tpu.memory_space<vmem>>, vector<8x128xf32>
      tpu.vector_store %arg6[%c0_72, %c0_73], %212 {strides = array<i32>} : memref<8x128xf32, #tpu.memory_space<vmem>>, vector<8x128xf32>,
    } else {
    }
    return
  }
  func.func @transform_0(%arg0: i32, %arg1: i32) -> (i32, i32) {
    %c0_i32 = arith.constant 0 : i32
    %c0_i32_0 = arith.constant 0 : i32
    return %arg0, %c0_i32 : i32, i32
  }
  func.func @transform_1(%arg0: i32, %arg1: i32) -> (i32, i32) {
    %c0_i32 = arith.constant 0 : i32
    %c0_i32_0 = arith.constant 0 : i32
    %c0_i32_1 = arith.constant 0 : i32
    return %c0_i32, %c0_i32_0 : i32, i32
  }
  func.func @transform_2(%arg0: i32, %arg1: i32) -> (i32, i32) {
    %c0_i32 = arith.constant 0 : i32
    %c0_i32_0 = arith.constant 0 : i32
    return %c0_i32, %arg1 : i32, i32
  }
  func.func @transform_3(%arg0: i32, %arg1: i32) -> (i32, i32) {
    %c0_i32 = arith.constant 0 : i32
    return %arg0, %arg1 : i32, i32
  }
  func.func @transform_4(%arg0: i32, %arg1: i32) -> (i32, i32) {
    %c0_i32 = arith.constant 0 : i32
    %c0_i32_0 = arith.constant 0 : i32
    return %arg0, %c0_i32 : i32, i32
  }
}

</mosaic_0001>

<bundles_post_ra>
// kernel: tpu_custom_call.1
= control target key start
LH: loop header
LB: loop body
LE: loop exit
PB: predicated region body
PF: predicated region fallthrough
CT: control target
= control target key end

     0   :  { %9 = vsyncpa [#allocation10], 0  ;;  %s1603_s0 = inlined_call_operand.hbm [shape: f32[8,128], index: 0, kind: input, shape index: {}]   ;;  %s1604_s1 = inlined_call_operand.hbm [shape: f32[8,8], index: 1, kind: input, shape index: {}]   ;;  %s1605_s2 = inlined_call_operand.hbm [shape: f32[8,256], index: 2, kind: input, shape index: {}]   ;;  %s1606_s3 = inlined_call_operand.hbm [shape: s8[8,256], index: 3, kind: input, shape index: {}]   ;;  %s1607_s4 = inlined_call_operand.hbm [shape: f32[8,128], index: 4, kind: output, shape index: {}]  }
   0x1   :  { %10 = vsyncpa [#allocation13], 0 }
   0x2   :  { %11 = vsyncpa [#allocation16], 0  ;;  %s29_s17 = sshll.u32 %s1604_s1, 4  ;;  %s30_s17 = int_to_ptr.hbm [resolvable:$true] %s29_s17 }
   0x3   :  { %12 = vsyncpa [#allocation11], 0  ;;  %s1202_s18 = smov [#allocation12]   ;;  %s18_s22 = sshll.u32 %s1603_s0, 4  ;;  %s19_s22 = int_to_ptr.hbm [resolvable:$true] %s18_s22 }
   0x4   :  { %s31_s19 = sshll.u32 %s1202_s18, 4  ;;  %s1203_s23 = smov [#allocation9]   ;;  %s32_s19 = int_to_ptr.vmem [resolvable:$true] %s31_s19 }
   0x5   :  { %34 = dma.hbm_to_vmem [thread:$0]  %s30_s17, 128, %s32_s19, [#allocation13]  }
   0x6   :  { %s20_s24 = sshll.u32 %s1203_s23, 4  ;;  %s40_s27 = sshll.u32 %s1605_s2, 4  ;;  %s21_s24 = int_to_ptr.vmem [resolvable:$true] %s20_s24  ;;  %s41_s27 = int_to_ptr.hbm [resolvable:$true] %s40_s27 }
   0x7   :  { %23 = dma.hbm_to_vmem [thread:$0]  %s19_s22, 128, %s21_s24, [#allocation10]  }
   0x8   :  { %s51_s29 = sshll.u32 %s1606_s3, 4  ;;  %s1204_s30 = smov [#allocation14]   ;;  %s52_s29 = int_to_ptr.hbm [resolvable:$true] %s51_s29 }
   0x9   :  { %s42_s5 = sshll.u32 %s1204_s30, 4  ;;  %s1205_s0 = smov [#allocation15]   ;;  %s43_s5 = int_to_ptr.vmem [resolvable:$true] %s42_s5 }
   0xa   :  { %45 = dma.hbm_to_vmem [thread:$0]  %s41_s27, 256, %s43_s5, [#allocation13]  }
   0xb   :  { %s53_s6 = sshll.u32 %s1205_s0, 4  ;;  %s54_s6 = int_to_ptr.vmem [resolvable:$true] %s53_s6 }
   0xc   :  { %56 = dma.hbm_to_vmem [thread:$0]  %s52_s29, 64, %s54_s6, [#allocation16]  }
   0xd   :  { %1194 = dma.done.wait [#allocation10], 128  }
   0xe   :  { %1195 = vsyncadd [#allocation10], 4294967168 }
   0xf   :  { %1196 = dma.done.wait [#allocation13], 384  }
  0x10   :  { %1197 = vsyncadd [#allocation13], 4294966912 }
  0x11   :  { %1198 = dma.done.wait [#allocation16], 64  }
  0x12   :  { %1199 = vsyncadd [#allocation16], 4294967232  ;;  %vm79_vm0 = vcmask 64512   ;;  %v78_v0 = vld [vmem:[#allocation12] sm:$0xff]  ;;  %v1258_v1 = vld [vmem:[#allocation9] sm:$0xff]  ;;  %s1206_s2 = smov 120   ;;  %v415_v2 = vlaneseq }
  0x13   :  { %98 = vmatpush.msra.mxu0 %v78_v0  ;;  %103 = vrot.lane.b32.xlu0 %v1258_v1, %s1206_s2  ;;  %v1207_v19 = vmov 0   ;;  %v1208_v22 = vmov 2   ;;  %v1209_v24 = vmov 3   ;;  %v1210_v25 = vmov 1   ;;  %s1216_s3 = smov 103   ;;  %s1217_s7 = smov 102  }
  0x14   :  { %990 = vmatmul.msk.f32.vlgmr.msra.gmra.mxu0 %vm79_vm0, %v1258_v1  ;;  %122 = vmatpush.msra.mxu1 %v78_v0  ;;  %v416_v3 = vshrl.u32 %v415_v2, 7  ;;  %v1211_v26 = vmov 6   ;;  %v1212_v27 = vmov 4   ;;  %v1213_v28 = vmov 5   ;;  %s1218_s8 = smov 112   ;;  %s1220_s9 = smov [#allocation17]  }
  0x15   :  { %v1214_v29 = vmov 7   ;;  %v150_v56 = vld [vmem:[#allocation14] ss:$8 sm:$0x3]  ;;  %vm622_vm5 = vcmask 195712   ;;  %vm761_vm7 = vcmask 1041409  }
  0x16   :  { %1013 = vset.pattern.permute.xlu2 %v416_v3  ;;  %1012 = vset.pattern.permute.xlu1 %v416_v3  ;;  %v1290_v57 = vperm.slane %v150_v56, 0  ;;  %v1292_v58 = vperm.slane %v150_v56, 1  ;;  %vm763_vm11 = vcmask 1042434   ;;  %vm765_vm13 = vcmask 1043459   ;;  %s976_s10 = sshll.u32 %s1220_s9, 4  ;;  %s978_s13 = sshll.u32 %s1607_s4, 4  ;;  %s977_s10 = int_to_ptr.vmem [resolvable:$true] %s976_s10  ;;  %s979_s13 = int_to_ptr.hbm [resolvable:$true] %s978_s13 }
  0x17   :  { %1011 = vset.pattern.permute.xlu0 %v416_v3 }
  0x85   :  { %v104_v4 = vpop.permute.xlu0 %103 }
  0x86   :  { %991 = vmatmul.msk.f32.vlgmr.msra.gmra.mxu1 %vm79_vm0, %v104_v4  ;;  %v478_v4 = vperm.slane %v1258_v1, 0 }
  0x91   :  { %v100_v5 = vpop.f32.mrf.mxu0 }
  0x92   :  { %v127_v6 = vmul.f32 10.0, %v100_v5  ;;  %139 = vst.msk [vmem:[#allocation2] sm:$0xff] %vm79_vm0, %v100_v5 }
  0x94   :  { %v128_v7 = vadd.f32 8.0, %v127_v6 }
  0x96   :  { %vm131_vm1 = vcmp.ge.f32.partialorder %v128_v7, 0.0  ;;  %v132_v8 = vfloor.f32 %v128_v7  ;;  %v133_v9 = vceil.f32 %v128_v7  ;;  %v471_v7 = vrot.slane %v1258_v1, 1 }
  0x98   :  { %v134_v10 = vsel %vm131_vm1, %v132_v8, %v133_v9 }
  0x99   :  { %v141_v11 = vmul.f32 -2.0, %v134_v10  ;;  %v411_v12 = vld [vmem:[#allocation2] sm:$0xff]  ;;  %v145_v39 = vmul.f32 %v134_v10, %v134_v10 }
  0x9a   :  { %v428_v13 = vperm.slane %v411_v12, 2  ;;  %v421_v14 = vperm.slane %v411_v12, 1  ;;  %v414_v15 = vperm.slane %v411_v12, 0  ;;  %v442_v16 = vperm.slane %v411_v12, 4 }
  0x9b   :  { %142 = vst.msk [vmem:[#allocation4] sm:$0xff] %vm79_vm0, %v141_v11  ;;  %v435_v17 = vperm.slane %v411_v12, 3  ;;  %v456_v20 = vperm.slane %v411_v12, 6  ;;  %v449_v21 = vperm.slane %v411_v12, 5  ;;  %v463_v23 = vperm.slane %v411_v12, 7 }
  0x9c   :  { %433 = vperm.xlu2 %1013, %v428_v13   ;;  %426 = vperm.xlu1 %1012, %v421_v14   ;;  %v1318_v11 = vperm.slane %v471_v7, 0  ;;  %v473_v14 = vrot.slane %v1258_v1, 3 }
  0x9d   :  { %419 = vperm.xlu0 %1011, %v414_v15  }
  0xa2   :  { %v171_v18 = vld [vmem:[#allocation4] sm:$0xff] }
  0xa4   :  { %447 = vperm.xlu2 %1013, %v442_v16   ;;  %440 = vperm.xlu1 %1012, %v435_v17   ;;  %v1325_v17 = vperm.slane %v473_v14, 0 }
  0xa5   :  { %1014 = vset.pattern.permute.xlu0 %v1207_v19 }
  0xa6   :  { %175 = vperm.xlu0 %1014, %v171_v18  }
  0xac   :  { %461 = vperm.xlu2 %1013, %v456_v20   ;;  %454 = vperm.xlu1 %1012, %v449_v21   ;;  %v472_v21 = vrot.slane %v1258_v1, 2 }
  0xae   :  { %1016 = vset.pattern.permute.xlu0 %v1208_v22 }
  0xaf   :  { %226 = vperm.xlu0 %1016, %v171_v18  }
  0xb4   :  { %468 = vperm.xlu2 %1013, %v463_v23   ;;  %1017 = vset.pattern.permute.xlu1 %v1209_v24  ;;  %v1332_v23 = vperm.slane %v472_v21, 0 }
  0xb5   :  { %245 = vperm.xlu1 %1017, %v171_v18  }
  0xbc   :  { %1015 = vset.pattern.permute.xlu2 %v1210_v25 }
  0xbd   :  { %207 = vperm.xlu2 %1015, %v171_v18   ;;  %1020 = vset.pattern.permute.xlu1 %v1211_v26 }
  0xbe   :  { %302 = vperm.xlu1 %1020, %v171_v18  }
  0xc5   :  { %1018 = vset.pattern.permute.xlu2 %v1212_v27 }
  0xc6   :  { %264 = vperm.xlu2 %1018, %v171_v18   ;;  %1023 = vset.pattern.permute.xlu1 %v416_v3 }
  0xce   :  { %1019 = vset.pattern.permute.xlu2 %v1213_v28 }
  0xcf   :  { %283 = vperm.xlu2 %1019, %v171_v18  }
  0xd7   :  { %1021 = vset.pattern.permute.xlu2 %v1214_v29 }
  0xd8   :  { %321 = vperm.xlu2 %1021, %v171_v18  }
  0xe0   :  { %1022 = vset.pattern.permute.xlu2 %v416_v3 }
  0xf6   :  { %v1272_v30 = vpop.permute.xlu2 %433 }
  0xfe   :  { %v1274_v31 = vpop.permute.xlu2 %447 }
 0x103   :  { %v124_v32 = vpop.f32.mrf.mxu1 }
 0x104   :  { %v129_v33 = vmul.f32 10.0, %v124_v32  ;;  %140 = vst.msk [vmem:[#allocation3] sm:$0xff] %vm79_vm0, %v124_v32 }
 0x106   :  { %v130_v34 = vadd.f32 8.0, %v129_v33  ;;  %v1277_v35 = vpop.permute.xlu2 %461 }
 0x108   :  { %vm135_vm2 = vcmp.ge.f32.partialorder %v130_v34, 0.0  ;;  %v136_v36 = vfloor.f32 %v130_v34  ;;  %v137_v37 = vceil.f32 %v130_v34 }
 0x10a   :  { %v138_v38 = vsel %vm135_vm2, %v136_v36, %v137_v37  ;;  %vm767_vm2 = vcmask 1044484  }
 0x10b   :  { %v143_v40 = vmul.f32 -2.0, %v138_v38  ;;  %v146_v41 = vmul.f32 %v138_v38, %v138_v38  ;;  %v412_v42 = vld [vmem:[#allocation3] sm:$0xff]  ;;  %v155_v38 = vld [vmem:[#allocation15] sm:$0xf] }
 0x10c   :  { %v516_v43 = vperm.slane %v412_v42, 2  ;;  %v502_v44 = vperm.slane %v412_v42, 0  ;;  %v544_v48 = vperm.slane %v412_v42, 6  ;;  %v509_v49 = vperm.slane %v412_v42, 1 }
 0x10d   :  { %144 = vst.msk [vmem:[#allocation5] sm:$0xff] %vm79_vm0, %v143_v40  ;;  %v147_v45 = vadd.f32 %v146_v41, %v145_v39  ;;  %v523_v51 = vperm.slane %v412_v42, 3  ;;  %v530_v53 = vperm.slane %v412_v42, 4  ;;  %v537_v55 = vperm.slane %v412_v42, 5 }
 0x10e   :  { %521 = vperm.xlu1 %1023, %v516_v43   ;;  %507 = vperm.xlu2 %1022, %v502_v44   ;;  %v1280_v46 = vpop.permute.xlu2 %468  ;;  %v551_v62 = vperm.slane %v412_v42, 7  ;;  %v1302_v63 = vpop.permute.xlu1 %426  ;;  %v152_v41 = vld [vmem:[#allocation14 + $0x1] ss:$8 sm:$0x3]  ;;  %v156_v42 = vunpack.c.0.s8 %v155_v38  ;;  %v157_v43 = vunpack.c.1.s8 %v155_v38 }
 0x10f   :  { %148 = vst.msk [vmem:[#allocation6] sm:$0xff] %vm79_vm0, %v147_v45  ;;  %v1313_v8 = vpop.permute.xlu0 %419  ;;  %v1345_v44 = vperm.slane %v152_v41, 0  ;;  %v1347_v45 = vperm.slane %v152_v41, 1 }
 0x114   :  { %v172_v47 = vld [vmem:[#allocation5] sm:$0xff] }
 0x115   :  { %232 = vperm.xlu0 %1016, %v172_v47  }
 0x116   :  { %549 = vperm.xlu1 %1023, %v544_v48   ;;  %514 = vperm.xlu2 %1022, %v509_v49   ;;  %v1305_v0 = vpop.permute.xlu1 %440  ;;  %v158_v48 = vcvt.s32.f32 %v156_v42  ;;  %v159_v49 = vcvt.s32.f32 %v157_v43 }
 0x117   :  { %v1283_v50 = vpop.permute.xlu2 %207 }
 0x118   :  { %v1322_v16 = vpop.permute.xlu0 %175  ;;  %vm160_vm3 = vcmp.gt.f32.partialorder %v158_v48, 0.0  ;;  %vm161_vm4 = vcmp.gt.f32.partialorder %v159_v49, 0.0 }
 0x11d   :  { %1028 = vset.pattern.permute.xlu0 %v1213_v28 }
 0x11e   :  { %1024 = vset.pattern.permute.xlu1 %v1207_v19  ;;  %528 = vperm.xlu2 %1022, %v523_v51   ;;  %v1307_v3 = vpop.permute.xlu1 %454  ;;  %v210_v51 = vmul.f32 %v1283_v50, %v1290_v57 }
 0x11f   :  { %289 = vperm.xlu0 %1028, %v172_v47   ;;  %187 = vperm.xlu1 %1024, %v172_v47  }
 0x120   :  { %v1286_v52 = vpop.permute.xlu2 %264 }
 0x126   :  { %535 = vperm.xlu2 %1022, %v530_v53   ;;  %v211_v53 = vmul.f32 %v1283_v50, %v1292_v58 }
 0x127   :  { %1029 = vset.pattern.permute.xlu0 %v1211_v26  ;;  %v1316_v10 = vpop.permute.xlu1 %245 }
 0x128   :  { %308 = vperm.xlu0 %1029, %v172_v47  }
 0x129   :  { %v1288_v54 = vpop.permute.xlu2 %283 }
 0x12e   :  { %542 = vperm.xlu2 %1022, %v537_v55  }
 0x130   :  { %1030 = vset.pattern.permute.xlu0 %v1214_v29  ;;  %v1327_v18 = vpop.permute.xlu1 %302 }
 0x131   :  { %327 = vperm.xlu0 %1030, %v172_v47  }
 0x132   :  { %v322_v59 = vpop.permute.xlu2 %321 }
 0x133   :  { %v1295_v60 = vmul.f32 %v322_v59, %v1290_v57  ;;  %v1298_v61 = vmul.f32 %v322_v59, %v1292_v58 }
 0x136   :  { %556 = vperm.xlu2 %1022, %v551_v62  }
 0x13e   :  { %1025 = vset.pattern.permute.xlu2 %v1210_v25 }
 0x13f   :  { %213 = vperm.xlu2 %1025, %v172_v47  }
 0x147   :  { %1026 = vset.pattern.permute.xlu2 %v1209_v24  ;;  %v227_v24 = vpop.permute.xlu0 %226 }
 0x148   :  { %251 = vperm.xlu2 %1026, %v172_v47  }
 0x150   :  { %1027 = vset.pattern.permute.xlu2 %v1212_v27  ;;  %v474_v27 = vrot.slane %v1258_v1, 4 }
 0x151   :  { %270 = vperm.xlu2 %1027, %v172_v47   ;;  %v154_v47 = vld [vmem:[#allocation14 + $0x2] ss:$8 sm:$0x3] }
 0x152   :  { %v1336_v32 = vperm.slane %v474_v27, 0  ;;  %v163_v62 = vperm.slane %v154_v47, 0  ;;  %v286_v27 = vmul.f32 %v1288_v54, %v1290_v57 }
 0x168   :  { %v508_v5 = vpop.permute.xlu2 %507 }
 0x169   :  { %v558_v6 = vsub.f32 %v508_v5, %v478_v4  ;;  %v164_v5 = vperm.slane %v154_v47, 1 }
 0x16b   :  { %v574_v9 = vmul.f32 %v558_v6, %v558_v6 }
 0x16d   :  { %590 = vrot.lane.b32.xlu2 %v574_v9, %s1206_s2 }
 0x170   :  { %v515_v12 = vpop.permute.xlu2 %514 }
 0x171   :  { %v559_v13 = vsub.f32 %v515_v12, %v1318_v11  ;;  %v229_v12 = vmul.f32 %v227_v24, %v1290_v57 }
 0x173   :  { %v575_v15 = vmul.f32 %v559_v13, %v559_v13  ;;  %v230_v13 = vmul.f32 %v227_v24, %v1292_v58  ;;  %v287_v24 = vmul.f32 %v1288_v54, %v1292_v58 }
 0x175   :  { %592 = vrot.lane.b32.xlu1 %v575_v15, %s1206_s2 }
 0x178   :  { %v529_v19 = vpop.permute.xlu2 %528 }
 0x179   :  { %v561_v20 = vsub.f32 %v529_v19, %v1325_v17 }
 0x17b   :  { %v577_v22 = vmul.f32 %v561_v20, %v561_v20 }
 0x17d   :  { %596 = vrot.lane.b32.xlu0 %v577_v22, %s1206_s2 }
 0x180   :  { %v522_v25 = vpop.permute.xlu1 %521  ;;  %v536_v26 = vpop.permute.xlu2 %535 }
 0x181   :  { %v560_v28 = vsub.f32 %v522_v25, %v1332_v23  ;;  %v562_v33 = vsub.f32 %v536_v26, %v1336_v32  ;;  %v1365_v25 = vsel %vm160_vm3, %v163_v62, 1e+30  ;;  %v1367_v26 = vsel %vm161_vm4, %v164_v5, 1e+30 }
 0x183   :  { %v576_v29 = vmul.f32 %v560_v28, %v560_v28  ;;  %v578_v37 = vmul.f32 %v562_v33, %v562_v33 }
 0x185   :  { %594 = vrot.lane.b32.xlu1 %v576_v29, %s1206_s2 }
 0x187   :  { %v233_v34 = vpop.permute.xlu0 %232 }
 0x188   :  { %v1340_v36 = vpop.permute.xlu2 %542  ;;  %v235_v55 = vmul.f32 %v233_v34, %v1345_v44  ;;  %v236_v56 = vmul.f32 %v233_v34, %v1347_v45  ;;  %v1361_v50 = vpop.permute.xlu1 %549 }
 0x18a   :  { %v237_v21 = vadd.f32 %v235_v55, %v229_v12  ;;  %v238_v22 = vadd.f32 %v236_v56, %v230_v13  ;;  %v267_v13 = vmul.f32 %v1286_v52, %v1290_v57 }
 0x18c   :  { %v239_v38 = vadd.f32 %v237_v21, %v1365_v25 }
 0x18d   :  { %598 = vrot.lane.b32.xlu1 %v578_v37, %s1206_s2 }
 0x190   :  { %v1343_v39 = vpop.permute.xlu2 %556 }
 0x191   :  { %v290_v40 = vpop.permute.xlu0 %289 }
 0x192   :  { %v292_v14 = vmul.f32 %v290_v40, %v1345_v44  ;;  %v293_v15 = vmul.f32 %v290_v40, %v1347_v45  ;;  %v240_v40 = vadd.f32 %v238_v22, %v1367_v26 }
 0x194   :  { %v294_v33 = vadd.f32 %v292_v14, %v286_v27  ;;  %v295_v34 = vadd.f32 %v293_v15, %v287_v24  ;;  %v241_v49 = vmin.f32 %v239_v38, %v240_v40  ;;  %v268_v14 = vmul.f32 %v1286_v52, %v1292_v58 }
 0x195   :  { %v249_v38 = vmul.f32 %v1316_v10, %v1292_v58 }
 0x196   :  { %v296_v54 = vadd.f32 %v294_v33, %v1365_v25  ;;  %v297_v48 = vadd.f32 %v295_v34, %v1367_v26 }
 0x198   :  { %v298_v56 = vmin.f32 %v296_v54, %v297_v48 }
 0x199   :  { %v214_v59 = vpop.permute.xlu2 %213 }
 0x19a   :  { %v216_v6 = vmul.f32 %v214_v59, %v1345_v44  ;;  %v217_v7 = vmul.f32 %v214_v59, %v1347_v45  ;;  %v1357_v9 = vpop.permute.xlu0 %308 }
 0x19b   :  { %v312_v54 = vmul.f32 %v1357_v9, %v1347_v45 }
 0x19c   :  { %v218_v19 = vadd.f32 %v216_v6, %v210_v51  ;;  %v219_v20 = vadd.f32 %v217_v7, %v211_v53  ;;  %v188_v51 = vpop.permute.xlu1 %187 }
 0x19d   :  { %v195_v5 = vmul.f32 %v1345_v44, %v188_v51  ;;  %v196_v6 = vmul.f32 %v1347_v45, %v188_v51 }
 0x19e   :  { %v220_v28 = vadd.f32 %v218_v19, %v1365_v25  ;;  %v221_v29 = vadd.f32 %v219_v20, %v1367_v26 }
 0x1a0   :  { %v222_v37 = vmin.f32 %v220_v28, %v221_v29 }
 0x1a2   :  { %223 = vmin.xlane.f32.xlu2 %v222_v37  ;;  %v252_v41 = vpop.permute.xlu2 %251  ;;  %v248_v37 = vmul.f32 %v1316_v10, %v1290_v57  ;;  %v305_v10 = vmul.f32 %v1327_v18, %v1290_v57 }
 0x1a3   :  { %v328_v42 = vpop.permute.xlu0 %327  ;;  %v255_v29 = vmul.f32 %v252_v41, %v1347_v45 }
 0x1a4   :  { %v330_v43 = vmul.f32 %v328_v42, %v1345_v44  ;;  %v331_v47 = vmul.f32 %v328_v42, %v1347_v45 }
 0x1a5   :  { %v257_v42 = vadd.f32 %v255_v29, %v249_v38 }
 0x1a6   :  { %v332_v53 = vadd.f32 %v330_v43, %v1295_v60  ;;  %v333_v55 = vadd.f32 %v331_v47, %v1298_v61  ;;  %v183_v60 = vmul.f32 %v1290_v57, %v1322_v16  ;;  %v184_v61 = vmul.f32 %v1292_v58, %v1322_v16 }
 0x1a7   :  { %242 = vmin.xlane.f32.xlu0 %v241_v49  ;;  %v254_v16 = vmul.f32 %v252_v41, %v1345_v44  ;;  %v475_v47 = vrot.slane %v1258_v1, 5  ;;  %v311_v41 = vmul.f32 %v1357_v9, %v1345_v44  ;;  %v259_v49 = vadd.f32 %v257_v42, %v1367_v26 }
 0x1a8   :  { %v1384_v59 = vadd.f32 %v332_v53, %v1365_v25  ;;  %v1387_v62 = vadd.f32 %v333_v55, %v1367_v26  ;;  %v197_v20 = vadd.f32 %v195_v5, %v183_v60  ;;  %v198_v21 = vadd.f32 %v196_v6, %v184_v61 }
 0x1a9   :  { %v256_v40 = vadd.f32 %v254_v16, %v248_v37  ;;  %v1420_v51 = vperm.slane %v475_v47, 0  ;;  %v306_v53 = vmul.f32 %v1327_v18, %v1292_v58  ;;  %v476_v55 = vrot.slane %v1258_v1, 6 }
 0x1aa   :  { %299 = vmin.xlane.f32.xlu2 %v298_v56  ;;  %v336_v7 = vmin.f32 %v1384_v59, %v1387_v62  ;;  %v201_v33 = vadd.f32 %v197_v20, %v1365_v25  ;;  %v202_v52 = vadd.f32 %v198_v21, %v1367_v26  ;;  %v313_v56 = vadd.f32 %v311_v41, %v305_v10 }
 0x1ab   :  { %v271_v12 = vpop.permute.xlu2 %270  ;;  %v258_v48 = vadd.f32 %v256_v40, %v1365_v25  ;;  %v314_v5 = vadd.f32 %v312_v54, %v306_v53  ;;  %v1429_v9 = vperm.slane %v476_v55, 0  ;;  %v494_v57 = vsub.f32 %v1313_v8, %v478_v4 }
 0x1ac   :  { %v273_v15 = vmul.f32 %v271_v12, %v1345_v44  ;;  %v274_v19 = vmul.f32 %v271_v12, %v1347_v45  ;;  %v203_v43 = vmin.f32 %v201_v33, %v202_v52  ;;  %v563_v44 = vsub.f32 %v1340_v36, %v1420_v51 }
 0x1ad   :  { %v260_v45 = vmin.f32 %v258_v48, %v259_v49  ;;  %v315_v60 = vadd.f32 %v313_v56, %v1365_v25  ;;  %v316_v61 = vadd.f32 %v314_v5, %v1367_v26  ;;  %v564_v58 = vsub.f32 %v1361_v50, %v1429_v9 }
 0x1ae   :  { %v275_v22 = vadd.f32 %v273_v15, %v267_v13  ;;  %v276_v27 = vadd.f32 %v274_v19, %v268_v14  ;;  %v579_v6 = vmul.f32 %v563_v44, %v563_v44  ;;  %v566_v36 = vmul.f32 %v494_v57, %v494_v57 }
 0x1af   :  { %v317_v18 = vmin.f32 %v315_v60, %v316_v61  ;;  %v580_v12 = vmul.f32 %v564_v58, %v564_v58  ;;  %v477_v4 = vrot.slane %v1258_v1, 7  ;;  %v497_v33 = vsub.f32 %v1305_v0, %v1325_v17 }
 0x1b0   :  { %v277_v24 = vadd.f32 %v275_v22, %v1365_v25  ;;  %v278_v28 = vadd.f32 %v276_v27, %v1367_v26  ;;  %v495_v27 = vsub.f32 %v1302_v63, %v1318_v11  ;;  %v496_v47 = vsub.f32 %v1272_v30, %v1332_v23 }
 0x1b1   :  { %v1442_v19 = vperm.slane %v477_v4, 0  ;;  %v569_v38 = vmul.f32 %v497_v33, %v497_v33  ;;  %v498_v30 = vsub.f32 %v1274_v31, %v1336_v32 }
 0x1b2   :  { %v279_v34 = vmin.f32 %v277_v24, %v278_v28  ;;  %v567_v28 = vmul.f32 %v495_v27, %v495_v27  ;;  %v568_v10 = vmul.f32 %v496_v47, %v496_v47 }
 0x1b3   :  { %v565_v50 = vsub.f32 %v1343_v39, %v1442_v19  ;;  %v570_v61 = vmul.f32 %v498_v30, %v498_v30 }
 0x1b4   :  { %280 = vmin.xlane.f32.xlu0 %v279_v34 }
 0x1b5   :  { %v581_v21 = vmul.f32 %v565_v50, %v565_v50 }
 0x1b7   :  { %204 = vmin.xlane.f32.xlu1 %v203_v43 }
 0x1bf   :  { %261 = vmin.xlane.f32.xlu1 %v260_v45 }
 0x1c2   :  { %600 = vrot.lane.b32.xlu2 %v579_v6, %s1206_s2 }
 0x1c7   :  { %v591_v13 = vpop.permute.xlu2 %590  ;;  %318 = vmin.xlane.f32.xlu1 %v317_v18 }
 0x1c8   :  { %v614_v14 = vadd.f32 %v591_v13, %v566_v36  ;;  %602 = vrot.lane.b32.xlu0 %v580_v12, %s1206_s2 }
 0x1ca   :  { %v623_v25 = vsel %vm622_vm5, %v614_v14, inf }
 0x1cb   :  { %v780_v26 = vrot.slane %v623_v25, 4 }
 0x1cd   :  { %v781_v15 = vmin.f32 %v623_v25, %v780_v26 }
 0x1cf   :  { %v782_v8 = vrot.slane %v781_v15, 2 }
 0x1d1   :  { %v783_v20 = vmin.f32 %v781_v15, %v782_v8 }
 0x1d3   :  { %v784_v22 = vrot.slane %v783_v20, 1 }
 0x1d5   :  { %v1449_v24 = vmin.f32 %v783_v20, %v784_v22 }
 0x1d7   :  { %1031 = vrsqrt.f32 %v1449_v24  ;;  %vm835_vm6 = vcmp.eq.f32.partialorder %v1449_v24, inf  ;;  %vm837_vm9 = vcmp.eq.f32.partialorder %v1449_v24, 0.0 }
 0x1dd   :  { %v1032_v34 = vpop.eup %1031 }
 0x1de   :  { %v829_v11 = vmul.f32 %v1032_v34, %v1449_v24 }
 0x1e0   :  { %604 = vrot.lane.b32.xlu1 %v581_v21, %s1206_s2  ;;  %v830_v54 = vmul.f32 %v1032_v34, %v829_v11 }
 0x1e2   :  { %v831_v56 = vmul.f32 0.5, %v830_v54 }
 0x1e7   :  { %v593_v16 = vpop.permute.xlu1 %592 }
 0x1e8   :  { %v615_v29 = vadd.f32 %v593_v16, %v567_v28  ;;  %v838_v16 = vand.u32 2147483648, %v1449_v24 }
 0x1ea   :  { %v626_v39 = vsel %vm622_vm5, %v615_v29, inf }
 0x1eb   :  { %624 = vmin.xlane.f32.xlu2 %v623_v25  ;;  %v786_v52 = vrot.slane %v626_v39, 4 }
 0x1ed   :  { %v787_v37 = vmin.f32 %v626_v39, %v786_v52 }
 0x1ef   :  { %v597_v40 = vpop.permute.xlu0 %596  ;;  %v788_v42 = vrot.slane %v787_v37, 2 }
 0x1f0   :  { %v617_v63 = vadd.f32 %v597_v40, %v569_v38 }
 0x1f1   :  { %v789_v43 = vmin.f32 %v787_v37, %v788_v42 }
 0x1f2   :  { %337 = vmin.xlane.f32.xlu0 %v336_v7  ;;  %v632_v0 = vsel %vm622_vm5, %v617_v63, inf  ;;  %v832_v7 = vsub.f32 1.5, %v831_v56 }
 0x1f3   :  { %633 = vmin.xlane.f32.xlu2 %v632_v0  ;;  %v798_v17 = vrot.slane %v632_v0, 4  ;;  %v790_v41 = vrot.slane %v789_v43, 1 }
 0x1f4   :  { %v833_v12 = vmul.f32 %v1032_v34, %v832_v7 }
 0x1f5   :  { %v799_v48 = vmin.f32 %v632_v0, %v798_v17  ;;  %v791_v49 = vmin.f32 %v789_v43, %v790_v41 }
 0x1f6   :  { %v834_v15 = vmul.f32 %v833_v12, %v1449_v24 }
 0x1f7   :  { %v800_v53 = vrot.slane %v799_v48, 2  ;;  %v595_v55 = vpop.permute.xlu1 %594  ;;  %1033 = vrsqrt.f32 %v791_v49  ;;  %vm847_vm8 = vcmp.eq.f32.partialorder %v791_v49, inf  ;;  %v850_v52 = vand.u32 2147483648, %v791_v49 }
 0x1f8   :  { %v616_v44 = vadd.f32 %v595_v55, %v568_v10  ;;  %v836_v28 = vsel %vm835_vm6, %v1449_v24, %v834_v15  ;;  %vm849_vm10 = vcmp.eq.f32.partialorder %v791_v49, 0.0  ;;  %vm340_vm6 = vcmask 7168  }
 0x1f9   :  { %v801_v5 = vmin.f32 %v799_v48, %v800_v53  ;;  %v839_v40 = vsel %vm837_vm9, %v838_v16, %v836_v28  ;;  %vm344_vm9 = vcmask 23552  }
 0x1fa   :  { %627 = vmin.xlane.f32.xlu0 %v626_v39  ;;  %v629_v23 = vsel %vm622_vm5, %v616_v44, inf }
 0x1fb   :  { %v802_v59 = vrot.slane %v801_v5, 1  ;;  %v792_v62 = vrot.slane %v629_v23, 4 }
 0x1fd   :  { %v1034_v45 = vpop.eup %1033  ;;  %v1465_v6 = vmin.f32 %v801_v5, %v802_v59  ;;  %v793_v60 = vmin.f32 %v629_v23, %v792_v62 }
 0x1fe   :  { %v841_v57 = vmul.f32 %v1034_v45, %v791_v49 }
 0x1ff   :  { %1035 = vrsqrt.f32 %v1465_v6  ;;  %v599_v58 = vpop.permute.xlu1 %598  ;;  %v794_v18 = vrot.slane %v793_v60, 2  ;;  %vm871_vm12 = vcmp.eq.f32.partialorder %v1465_v6, inf  ;;  %v874_v59 = vand.u32 2147483648, %v1465_v6 }
 0x200   :  { %v618_v36 = vadd.f32 %v599_v58, %v570_v61  ;;  %v842_v13 = vmul.f32 %v1034_v45, %v841_v57  ;;  %vm873_vm1 = vcmp.eq.f32.partialorder %v1465_v6, 0.0 }
 0x201   :  { %v795_v31 = vmin.f32 %v793_v60, %v794_v18 }
 0x202   :  { %v635_v32 = vsel %vm622_vm5, %v618_v36, inf  ;;  %v843_v14 = vmul.f32 0.5, %v842_v13  ;;  %v499_v36 = vsub.f32 %v1307_v3, %v1420_v51 }
 0x203   :  { %v804_v25 = vrot.slane %v635_v32, 4  ;;  %636 = vmin.xlane.f32.xlu0 %v635_v32  ;;  %v796_v26 = vrot.slane %v795_v31, 1 }
 0x204   :  { %v844_v4 = vsub.f32 1.5, %v843_v14  ;;  %v571_v14 = vmul.f32 %v499_v36, %v499_v36 }
 0x205   :  { %v1036_v8 = vpop.eup %1035  ;;  %v805_v50 = vmin.f32 %v635_v32, %v804_v25  ;;  %v797_v20 = vmin.f32 %v795_v31, %v796_v26 }
 0x206   :  { %v845_v21 = vmul.f32 %v1034_v45, %v844_v4  ;;  %v865_v22 = vmul.f32 %v1036_v8, %v1465_v6 }
 0x207   :  { %v806_v27 = vrot.slane %v805_v50, 2  ;;  %1037 = vrsqrt.f32 %v797_v20  ;;  %vm859_vm14 = vcmp.eq.f32.partialorder %v797_v20, inf  ;;  %v862_v5 = vand.u32 2147483648, %v797_v20 }
 0x208   :  { %v846_v29 = vmul.f32 %v845_v21, %v791_v49  ;;  %v866_v33 = vmul.f32 %v1036_v8, %v865_v22  ;;  %vm861_vm15 = vcmp.eq.f32.partialorder %v797_v20, 0.0 }
 0x209   :  { %v807_v39 = vmin.f32 %v805_v50, %v806_v27 }
 0x20a   :  { %630 = vmin.xlane.f32.xlu1 %v629_v23  ;;  %v848_v34 = vsel %vm847_vm8, %v791_v49, %v846_v29  ;;  %v867_v37 = vmul.f32 0.5, %v866_v33  ;;  %vm342_vm8 = vcmask 15360  }
 0x20b   :  { %v808_v38 = vrot.slane %v807_v39, 1  ;;  %v851_v42 = vsel %vm849_vm10, %v850_v52, %v848_v34  ;;  %vm346_vm10 = vcmask 31744   ;;  %v500_v52 = vsub.f32 %v1277_v35, %v1429_v9 }
 0x20c   :  { %v932_v63 = vsel %vm761_vm7, %v851_v42, %v839_v40  ;;  %v868_v47 = vsub.f32 1.5, %v867_v37 }
 0x20d   :  { %v1038_v11 = vpop.eup %1037  ;;  %v809_v43 = vmin.f32 %v807_v39, %v808_v38  ;;  %v572_v37 = vmul.f32 %v500_v52, %v500_v52 }
 0x20e   :  { %v853_v0 = vmul.f32 %v1038_v11, %v797_v20  ;;  %v869_v41 = vmul.f32 %v1036_v8, %v868_v47 }
 0x20f   :  { %1039 = vrsqrt.f32 %v809_v43  ;;  %vm883_vm3 = vcmp.eq.f32.partialorder %v809_v43, inf  ;;  %v886_v13 = vand.u32 2147483648, %v809_v43  ;;  %vm885_vm4 = vcmp.eq.f32.partialorder %v809_v43, 0.0 }
 0x210   :  { %v854_v17 = vmul.f32 %v1038_v11, %v853_v0  ;;  %v870_v24 = vmul.f32 %v869_v41, %v1465_v6  ;;  %v1215_v41 = vmov 1e+30  }
 0x211   :  { %149 = vst.msk [vmem:[#allocation7] sm:$0xff] %vm79_vm0, %v1215_v41 }
 0x212   :  { %v855_v54 = vmul.f32 0.5, %v854_v17  ;;  %v872_v30 = vsel %vm871_vm12, %v1465_v6, %v870_v24  ;;  %vm348_vm12 = vcmask 39936  }
 0x213   :  { %v875_v45 = vsel %vm873_vm1, %v874_v59, %v872_v30  ;;  %v501_v30 = vsub.f32 %v1280_v46, %v1442_v19 }
 0x214   :  { %v856_v48 = vsub.f32 1.5, %v855_v54 }
 0x215   :  { %v1040_v10 = vpop.eup %1039  ;;  %v224_v53 = vpop.xlane.xlu2 %223  ;;  %v573_v59 = vmul.f32 %v501_v30, %v501_v30 }
 0x216   :  { %v857_v49 = vmul.f32 %v1038_v11, %v856_v48  ;;  %v877_v55 = vmul.f32 %v1040_v10, %v809_v43 }
 0x218   :  { %v858_v44 = vmul.f32 %v857_v49, %v797_v20  ;;  %v878_v56 = vmul.f32 %v1040_v10, %v877_v55 }
 0x21a   :  { %v860_v23 = vsel %vm859_vm14, %v797_v20, %v858_v44  ;;  %v879_v62 = vmul.f32 0.5, %v878_v56  ;;  %v243_v8 = vpop.xlane.xlu0 %242 }
 0x21b   :  { %v863_v7 = vsel %vm861_vm15, %v862_v5, %v860_v23  ;;  %vm769_vm15 = vcmask 1045509  }
 0x21c   :  { %v880_v60 = vsub.f32 1.5, %v879_v62  ;;  %v933_v61 = vsel %vm763_vm11, %v863_v7, %v932_v63 }
 0x21d   :  { %v300_v57 = vpop.xlane.xlu2 %299  ;;  %v934_v58 = vsel %vm765_vm13, %v875_v45, %v933_v61 }
 0x21e   :  { %v881_v18 = vmul.f32 %v1040_v10, %v880_v60 }
 0x220   :  { %v882_v12 = vmul.f32 %v881_v18, %v809_v43 }
 0x222   :  { %v884_v31 = vsel %vm883_vm3, %v809_v43, %v882_v12 }
 0x223   :  { %v887_v32 = vsel %vm885_vm4, %v886_v13, %v884_v31  ;;  %vm771_vm4 = vcmask 1046534  }
 0x224   :  { %v935_v6 = vsel %vm767_vm2, %v887_v32, %v934_v58 }
 0x225   :  { %v601_v25 = vpop.permute.xlu2 %600 }
 0x226   :  { %v619_v26 = vadd.f32 %v601_v25, %v571_v14 }
 0x227   :  { %v281_v27 = vpop.xlane.xlu0 %280 }
 0x228   :  { %v638_v15 = vsel %vm622_vm5, %v619_v26, inf }
 0x229   :  { %v810_v4 = vrot.slane %v638_v15, 4  ;;  %639 = vmin.xlane.f32.xlu1 %v638_v15 }
 0x22a   :  { %v205_v50 = vpop.xlane.xlu1 %204 }
 0x22b   :  { %v811_v20 = vmin.f32 %v638_v15, %v810_v4  ;;  %v341_v21 = vsel %vm340_vm6, %v205_v50, %v224_v53 }
 0x22c   :  { %v343_v16 = vsel %vm342_vm8, %v341_v21, %v243_v8  ;;  %vm352_vm8 = vcmask 56320  }
 0x22d   :  { %v812_v3 = vrot.slane %v811_v20, 2 }
 0x22f   :  { %v813_v51 = vmin.f32 %v811_v20, %v812_v3 }
 0x231   :  { %v814_v22 = vrot.slane %v813_v51, 1 }
 0x232   :  { %v262_v28 = vpop.xlane.xlu1 %261 }
 0x233   :  { %v815_v29 = vmin.f32 %v813_v51, %v814_v22  ;;  %v345_v33 = vsel %vm344_vm9, %v343_v16, %v262_v28  ;;  %v1071_v51 = vld [vmem:[#allocation9] sm:$0xff]  ;;  %v361_v16 = vld [vmem:[#allocation6] sm:$0xff] }
 0x234   :  { %v347_v39 = vsel %vm346_vm10, %v345_v33, %v281_v27  ;;  %vm773_vm10 = vcmask 1047559  }
 0x235   :  { %1041 = vrsqrt.f32 %v815_v29  ;;  %v1489_v34 = vsel %vm348_vm12, %v347_v39, %v300_v57  ;;  %vm895_vm14 = vcmp.eq.f32.partialorder %v815_v29, inf  ;;  %v898_v24 = vand.u32 2147483648, %v815_v29 }
 0x236   :  { %vm897_vm1 = vcmp.eq.f32.partialorder %v815_v29, 0.0 }
 0x23a   :  { %v603_v38 = vpop.permute.xlu0 %602  ;;  %v319_v56 = vpop.xlane.xlu1 %318 }
 0x23b   :  { %v1042_v40 = vpop.eup %1041  ;;  %v620_v42 = vadd.f32 %v603_v38, %v572_v37 }
 0x23c   :  { %v889_v63 = vmul.f32 %v1042_v40, %v815_v29 }
 0x23d   :  { %v641_v11 = vsel %vm622_vm5, %v620_v42, inf }
 0x23e   :  { %642 = vmin.xlane.f32.xlu2 %v641_v11  ;;  %v816_v43 = vrot.slane %v641_v11, 4  ;;  %v890_v47 = vmul.f32 %v1042_v40, %v889_v63 }
 0x240   :  { %v817_v0 = vmin.f32 %v641_v11, %v816_v43  ;;  %v891_v17 = vmul.f32 0.5, %v890_v47 }
 0x242   :  { %v818_v54 = vrot.slane %v817_v0, 2  ;;  %v892_v35 = vsub.f32 1.5, %v891_v17 }
 0x244   :  { %v819_v9 = vmin.f32 %v817_v0, %v818_v54  ;;  %v893_v48 = vmul.f32 %v1042_v40, %v892_v35 }
 0x246   :  { %v820_v10 = vrot.slane %v819_v9, 1  ;;  %v894_v53 = vmul.f32 %v893_v48, %v815_v29 }
 0x248   :  { %v821_v49 = vmin.f32 %v819_v9, %v820_v10  ;;  %v896_v55 = vsel %vm895_vm14, %v815_v29, %v894_v53 }
 0x249   :  { %v899_v44 = vsel %vm897_vm1, %v898_v24, %v896_v55 }
 0x24a   :  { %1043 = vrsqrt.f32 %v821_v49  ;;  %v936_v5 = vsel %vm769_vm15, %v899_v44, %v935_v6  ;;  %vm907_vm3 = vcmp.eq.f32.partialorder %v821_v49, inf  ;;  %v910_v19 = vand.u32 2147483648, %v821_v49 }
 0x24b   :  { %vm909_vm6 = vcmp.eq.f32.partialorder %v821_v49, 0.0 }
 0x250   :  { %v1044_v23 = vpop.eup %1043 }
 0x251   :  { %v901_v62 = vmul.f32 %v1044_v23, %v821_v49 }
 0x252   :  { %v605_v7 = vpop.permute.xlu1 %604 }
 0x253   :  { %v621_v45 = vadd.f32 %v605_v7, %v573_v59  ;;  %v902_v60 = vmul.f32 %v1044_v23, %v901_v62 }
 0x255   :  { %v644_v61 = vsel %vm622_vm5, %v621_v45, inf  ;;  %v903_v57 = vmul.f32 0.5, %v902_v60  ;;  %vm350_vm5 = vcmask 48128  }
 0x256   :  { %v822_v58 = vrot.slane %v644_v61, 4  ;;  %645 = vmin.xlane.f32.xlu0 %v644_v61  ;;  %948 = vrot.lane.b32.xlu2 %v1258_v1, %s1216_s3  ;;  %v339_v1 = vld [vmem:[#allocation7] sm:$0xff]  ;;  %v351_v15 = vsel %vm350_vm5, %v1489_v34, %v319_v56 }
 0x257   :  { %v904_v18 = vsub.f32 1.5, %v903_v57 }
 0x258   :  { %v823_v36 = vmin.f32 %v644_v61, %v822_v58 }
 0x259   :  { %v905_v12 = vmul.f32 %v1044_v23, %v904_v18 }
 0x25a   :  { %v824_v13 = vrot.slane %v823_v36, 2 }
 0x25b   :  { %v906_v31 = vmul.f32 %v905_v12, %v821_v49 }
 0x25c   :  { %v825_v46 = vmin.f32 %v823_v36, %v824_v13 }
 0x25d   :  { %v908_v32 = vsel %vm907_vm3, %v821_v49, %v906_v31 }
 0x25e   :  { %v826_v14 = vrot.slane %v825_v46, 1  ;;  %v911_v6 = vsel %vm909_vm6, %v910_v19, %v908_v32 }
 0x25f   :  { %v937_v26 = vsel %vm771_vm4, %v911_v6, %v936_v5  ;;  %v1502_v5 = vpop.xlane.xlu2 %624 }
 0x260   :  { %v827_v25 = vmin.f32 %v825_v46, %v826_v14 }
 0x262   :  { %1045 = vrsqrt.f32 %v827_v25  ;;  %vm919_vm9 = vcmp.eq.f32.partialorder %v827_v25, inf  ;;  %v922_v34 = vand.u32 2147483648, %v827_v25  ;;  %vm921_vm12 = vcmp.eq.f32.partialorder %v827_v25, 0.0 }
 0x265   :  { %v338_v4 = vpop.xlane.xlu0 %337 }
 0x266   :  { %v353_v8 = vsel %vm352_vm8, %v351_v15, %v338_v4 }
 0x267   :  { %v354_v50 = vmin.f32 %v339_v1, %v353_v8  ;;  %v1508_v18 = vpop.xlane.xlu2 %633 }
 0x268   :  { %v1046_v20 = vpop.eup %1045 }
 0x269   :  { %356 = vst.msk [vmem:[#allocation7] sm:$0xff] %vm79_vm0, %v354_v50  ;;  %v913_v3 = vmul.f32 %v1046_v20, %v827_v25 }
 0x26a   :  { %952 = vrot.lane.b32.xlu0 %v1071_v51, %s1217_s7 }
 0x26b   :  { %v914_v21 = vmul.f32 %v1046_v20, %v913_v3 }
 0x26d   :  { %v915_v22 = vmul.f32 0.5, %v914_v21  ;;  %v1504_v61 = vpop.xlane.xlu0 %627 }
 0x26f   :  { %v916_v27 = vsub.f32 1.5, %v915_v22 }
 0x270   :  { %v360_v28 = vld [vmem:[#allocation7] sm:$0xff] }
 0x271   :  { %v917_v29 = vmul.f32 %v1046_v20, %v916_v27  ;;  %v362_v33 = vadd.f32 %v361_v16, %v360_v28 }
 0x273   :  { %v918_v39 = vmul.f32 %v917_v29, %v827_v25  ;;  %v363_v52 = vmax.f32 %v362_v33, 0.0 }
 0x275   :  { %v920_v37 = vsel %vm919_vm9, %v827_v25, %v918_v39  ;;  %1047 = vrsqrt.f32 %v363_v52  ;;  %vm371_vm14 = vcmp.eq.f32.partialorder %v363_v52, inf  ;;  %v374_v41 = vand.u32 2147483648, %v363_v52 }
 0x276   :  { %v923_v38 = vsel %vm921_vm12, %v922_v34, %v920_v37  ;;  %vm373_vm1 = vcmp.eq.f32.partialorder %v363_v52, 0.0  ;;  %v1513_v13 = vpop.xlane.xlu0 %636  ;;  %vm654_vm9 = vcmp.eq.f32.partialorder %v1502_v5, inf  ;;  %vm666_vm12 = vcmp.eq.f32.partialorder %v1504_v61, inf }
 0x277   :  { %v938_v40 = vsel %vm773_vm10, %v923_v38, %v937_v26 }
 0x278   :  { %939 = vrot.lane.b32.xlu1 %v938_v40, %s1218_s8 }
 0x27b   :  { %v1048_v42 = vpop.eup %1047 }
 0x27c   :  { %v365_v63 = vmul.f32 %v1048_v42, %v363_v52 }
 0x27d   :  { %v1506_v58 = vpop.xlane.xlu1 %630 }
 0x27e   :  { %v366_v11 = vmul.f32 %v1048_v42, %v365_v63 }
 0x280   :  { %v367_v43 = vmul.f32 0.5, %v366_v11 }
 0x282   :  { %v368_v47 = vsub.f32 1.5, %v367_v43 }
 0x284   :  { %v369_v0 = vmul.f32 %v1048_v42, %v368_v47 }
 0x286   :  { %v370_v17 = vmul.f32 %v369_v0, %v363_v52 }
 0x288   :  { %v372_v54 = vsel %vm371_vm14, %v363_v52, %v370_v17  ;;  %vm678_vm14 = vcmp.eq.f32.partialorder %v1506_v58, inf }
 0x289   :  { %v375_v35 = vsel %vm373_vm1, %v374_v41, %v372_v54  ;;  %vm668_vm1 = vcmp.eq.f32.partialorder %v1504_v61, 0.0 }
 0x28a   :  { %v376_v9 = vmul.f32 0.1, %v375_v35 }
 0x28c   :  { %v377_v48 = vmax.f32 %v376_v9, 0.0001 }
 0x28e   :  { %v378_v10 = vmin.f32 %v377_v48, 0.999 }
 0x290   :  { %v379_v53 = vsub.f32 1.0, %v378_v10 }
 0x292   :  { %v381_v24 = vsub.f32 1.0, %v379_v53  ;;  %v380_v7 = vadd.f32 1.0, %v379_v53 }
 0x294   :  { %1049 = vrcp.f32 %v381_v24  ;;  %v393_v56 = vand.u32 2147483648, %v381_v24  ;;  %v391_v23 = vand.u32 2147483647, %v381_v24  ;;  %vm387_vm6 = vweird.f32 %v381_v24 }
 0x296   :  { %v394_v62 = vor.u32 1.1754944e-38, %v393_v56  ;;  %vm392_vm8 = vcmp.eq.f32.partialorder %v391_v23, 8.507059e+37 }
 0x29a   :  { %v1050_v49 = vpop.eup %1049 }
 0x29b   :  { %v383_v55 = vmul.f32 %v1050_v49, %v381_v24  ;;  %vm388_vm3 = vweird.f32 %v1050_v49 }
 0x29c   :  { %vm389_vm5 = vmor %vm387_vm6, %vm388_vm3  ;;  %v1515_v46 = vpop.xlane.xlu1 %639  ;;  %vm656_vm3 = vcmp.eq.f32.partialorder %v1502_v5, 0.0  ;;  %vm680_vm6 = vcmp.eq.f32.partialorder %v1506_v58, 0.0 }
 0x29d   :  { %v384_v44 = vsub.f32 1.0, %v383_v55 }
 0x29f   :  { %v385_v30 = vmul.f32 %v1050_v49, %v384_v44 }
 0x2a1   :  { %v386_v59 = vadd.f32 %v1050_v49, %v385_v30  ;;  %v669_v30 = vand.u32 2147483648, %v1504_v61 }
 0x2a3   :  { %v390_v45 = vsel %vm389_vm5, %v1050_v49, %v386_v59  ;;  %vm690_vm5 = vcmp.eq.f32.partialorder %v1508_v18, inf }
 0x2a4   :  { %v395_v60 = vsel %vm392_vm8, %v394_v62, %v390_v45  ;;  %vm692_vm8 = vcmp.eq.f32.partialorder %v1508_v18, 0.0 }
 0x2a5   :  { %v396_v57 = vmul.f32 %v395_v60, %v380_v7  ;;  %v657_v60 = vand.u32 2147483648, %v1502_v5 }
 0x2a7   :  { %1051 = vlog2.f32 %v396_v57 }
 0x2a8   :  { %1053 = vrsqrt.f32 %v1502_v5 }
 0x2a9   :  { %1055 = vrsqrt.f32 %v1504_v61 }
 0x2aa   :  { %1057 = vrsqrt.f32 %v1506_v58 }
 0x2ab   :  { %1059 = vrsqrt.f32 %v1508_v18 }
 0x2ac   :  { %1061 = vrsqrt.f32 %v1513_v13 }
 0x2ad   :  { %v1052_v36 = vpop.eup %1051  ;;  %1063 = vrsqrt.f32 %v1515_v46 }
 0x2ae   :  { %v398_v12 = vmul.f32 0.6931472, %v1052_v36  ;;  %v1054_v31 = vpop.eup %1053  ;;  %v681_v36 = vand.u32 2147483648, %v1506_v58 }
 0x2af   :  { %v1056_v32 = vpop.eup %1055  ;;  %v648_v26 = vmul.f32 %v1054_v31, %v1502_v5 }
 0x2b0   :  { %v399_v19 = vmul.f32 0.5, %v398_v12  ;;  %v1058_v6 = vpop.eup %1057  ;;  %v660_v1 = vmul.f32 %v1056_v32, %v1504_v61 }
 0x2b1   :  { %v1518_v14 = vpop.xlane.xlu2 %642  ;;  %v672_v15 = vmul.f32 %v1058_v6, %v1506_v58  ;;  %v1060_v4 = vpop.eup %1059  ;;  %v649_v50 = vmul.f32 %v1054_v31, %v648_v26 }
 0x2b2   :  { %v400_v25 = vsel %vm79_vm0, %v399_v19, 0.0  ;;  %1065 = vrsqrt.f32 %v1518_v14  ;;  %v1062_v8 = vpop.eup %1061  ;;  %v661_v20 = vmul.f32 %v1056_v32, %v660_v1  ;;  %v684_v22 = vmul.f32 %v1060_v4, %v1508_v18 }
 0x2b3   :  { %401 = vadd.xlane.f32.xlu1 %v400_v25  ;;  %v1064_v3 = vpop.eup %1063  ;;  %v673_v51 = vmul.f32 %v1058_v6, %v672_v15  ;;  %v650_v27 = vmul.f32 0.5, %v649_v50  ;;  %v696_v29 = vmul.f32 %v1062_v8, %v1513_v13  ;;  %v705_v50 = vand.u32 2147483648, %v1513_v13 }
 0x2b4   :  { %v662_v28 = vmul.f32 0.5, %v661_v20  ;;  %v708_v16 = vmul.f32 %v1064_v3, %v1515_v46  ;;  %v685_v52 = vmul.f32 %v1060_v4, %v684_v22 }
 0x2b5   :  { %v674_v33 = vmul.f32 0.5, %v673_v51  ;;  %v651_v34 = vsub.f32 1.5, %v650_v27  ;;  %v697_v40 = vmul.f32 %v1062_v8, %v696_v29 }
 0x2b6   :  { %v663_v37 = vsub.f32 1.5, %v662_v28  ;;  %v709_v38 = vmul.f32 %v1064_v3, %v708_v16  ;;  %v686_v11 = vmul.f32 0.5, %v685_v52  ;;  %v729_v28 = vand.u32 2147483648, %v1518_v14 }
 0x2b7   :  { %v675_v42 = vsub.f32 1.5, %v674_v33  ;;  %v652_v43 = vmul.f32 %v1054_v31, %v651_v34  ;;  %v698_v17 = vmul.f32 0.5, %v697_v40  ;;  %v1549_v31 = vand.u32 127, %v415_v2 }
 0x2b8   :  { %v1066_v21 = vpop.eup %1065  ;;  %v664_v47 = vmul.f32 %v1056_v32, %v663_v37  ;;  %v710_v0 = vmul.f32 0.5, %v709_v38  ;;  %v687_v35 = vsub.f32 1.5, %v686_v11 }
 0x2b9   :  { %v720_v39 = vmul.f32 %v1066_v21, %v1518_v14  ;;  %v676_v41 = vmul.f32 %v1058_v6, %v675_v42  ;;  %v653_v9 = vmul.f32 %v652_v43, %v1502_v5  ;;  %v699_v24 = vsub.f32 1.5, %v698_v17 }
 0x2ba   :  { %v665_v48 = vmul.f32 %v664_v47, %v1504_v61  ;;  %v711_v10 = vsub.f32 1.5, %v710_v0  ;;  %v688_v44 = vmul.f32 %v1060_v4, %v687_v35 }
 0x2bb   :  { %v721_v63 = vmul.f32 %v1066_v21, %v720_v39  ;;  %v677_v49 = vmul.f32 %v676_v41, %v1506_v58  ;;  %v655_v59 = vsel %vm654_vm9, %v1502_v5, %v653_v9  ;;  %v700_v62 = vmul.f32 %v1062_v8, %v699_v24 }
 0x2bc   :  { %v667_v56 = vsel %vm666_vm12, %v1504_v61, %v665_v48  ;;  %v712_v23 = vmul.f32 %v1064_v3, %v711_v10  ;;  %v689_v57 = vmul.f32 %v688_v44, %v1508_v18  ;;  %v658_v32 = vsel %vm656_vm3, %v657_v60, %v655_v59  ;;  %v949_v48 = vpop.permute.xlu2 %948 }
 0x2bd   :  { %v722_v54 = vmul.f32 0.5, %v721_v63  ;;  %v679_v7 = vsel %vm678_vm14, %v1506_v58, %v677_v49  ;;  %v670_v19 = vsel %vm668_vm1, %v669_v30, %v667_v56  ;;  %v701_v61 = vmul.f32 %v700_v62, %v1513_v13  ;;  %v1073_v49 = vld [vmem:[#allocation2] sm:$0xff] }
 0x2be   :  { %v682_v6 = vsel %vm680_vm6, %v681_v36, %v679_v7  ;;  %v713_v25 = vmul.f32 %v712_v23, %v1515_v46  ;;  %v691_v1 = vsel %vm690_vm5, %v1508_v18, %v689_v57  ;;  %v693_v5 = vand.u32 2147483648, %v1508_v18 }
 0x2bf   :  { %v723_v55 = vsub.f32 1.5, %v722_v54  ;;  %v754_v58 = vperm.slane %v670_v19, %v1549_v31  ;;  %v753_v4 = vperm.slane %v658_v32, %v1549_v31  ;;  %vm702_vm9 = vcmp.eq.f32.partialorder %v1513_v13, inf }
 0x2c0   :  { %vm714_vm12 = vcmp.eq.f32.partialorder %v1515_v46, inf  ;;  %v755_v8 = vperm.slane %v682_v6, %v1549_v31  ;;  %vm726_vm14 = vcmp.eq.f32.partialorder %v1518_v14, inf  ;;  %v703_v51 = vsel %vm702_vm9, %v1513_v13, %v701_v61 }
 0x2c1   :  { %v724_v45 = vmul.f32 %v1066_v21, %v723_v55  ;;  %v715_v3 = vsel %vm714_vm12, %v1515_v46, %v713_v25  ;;  %v717_v21 = vand.u32 2147483648, %v1515_v46  ;;  %v694_v22 = vsel %vm692_vm8, %v693_v5, %v691_v1 }
 0x2c2   :  { %vm716_vm1 = vcmp.eq.f32.partialorder %v1515_v46, 0.0  ;;  %v762_v29 = vsel %vm761_vm7, %v754_v58, %v753_v4  ;;  %vm704_vm3 = vcmp.eq.f32.partialorder %v1513_v13, 0.0  ;;  %vm728_vm6 = vcmp.eq.f32.partialorder %v1518_v14, 0.0 }
 0x2c3   :  { %v725_v2 = vmul.f32 %v724_v45, %v1518_v14  ;;  %v718_v33 = vsel %vm716_vm1, %v717_v21, %v715_v3  ;;  %v764_v39 = vsel %vm763_vm11, %v755_v8, %v762_v29  ;;  %v706_v52 = vsel %vm704_vm3, %v705_v50, %v703_v51 }
 0x2c4   :  { %v756_v37 = vperm.slane %v694_v22, %v1549_v31  ;;  %v758_v46 = vperm.slane %v718_v33, %v1549_v31  ;;  %v757_v42 = vperm.slane %v706_v52, %v1549_v31  ;;  %v951_v55 = vsub.f32 %v1073_v49, %v949_v48 }
 0x2c5   :  { %v727_v27 = vsel %vm726_vm14, %v1518_v14, %v725_v2  ;;  %v1219_v23 = vmov 8.0  }
 0x2c6   :  { %v730_v34 = vsel %vm728_vm6, %v729_v28, %v727_v27  ;;  %v766_v40 = vsel %vm765_vm13, %v756_v37, %v764_v39  ;;  %v956_v56 = vmul.f32 %v951_v55, %v951_v55 }
 0x2c7   :  { %v759_v14 = vperm.slane %v730_v34, %v1549_v31  ;;  %v768_v43 = vsel %vm767_vm2, %v757_v42, %v766_v40  ;;  %vm960_vm2 = vcmp.eq.s32.totalorder %v1549_v31, 1 }
 0x2c8   :  { %v770_v0 = vsel %vm769_vm15, %v758_v46, %v768_v43  ;;  %vm959_vm15 = vcmp.eq.s32.totalorder %v1549_v31, 0 }
 0x2c9   :  { %v1533_v53 = vpop.xlane.xlu0 %645  ;;  %v772_v17 = vsel %vm771_vm4, %v759_v14, %v770_v0 }
 0x2ca   :  { %1067 = vrsqrt.f32 %v1533_v53  ;;  %vm738_vm7 = vcmp.eq.f32.partialorder %v1533_v53, inf  ;;  %v741_v13 = vand.u32 2147483648, %v1533_v53  ;;  %vm740_vm11 = vcmp.eq.f32.partialorder %v1533_v53, 0.0 }
 0x2cb   :  { %1069 = vrcp.f32 %v1219_v23 }
 0x2d0   :  { %v1068_v12 = vpop.eup %1067 }
 0x2d1   :  { %v732_v26 = vmul.f32 %v1068_v12, %v1533_v53  ;;  %v1070_v59 = vpop.eup %1069 }
 0x2d2   :  { %v404_v62 = vmul.f32 8.0, %v1070_v59  ;;  %vm408_vm13 = vweird.f32 %v1070_v59 }
 0x2d3   :  { %v733_v15 = vmul.f32 %v1068_v12, %v732_v26 }
 0x2d4   :  { %v405_v7 = vsub.f32 1.0, %v404_v62 }
 0x2d5   :  { %v734_v20 = vmul.f32 0.5, %v733_v15 }
 0x2d6   :  { %v406_v45 = vmul.f32 %v1070_v59, %v405_v7 }
 0x2d7   :  { %v735_v16 = vsub.f32 1.5, %v734_v20 }
 0x2d8   :  { %v407_v60 = vadd.f32 %v1070_v59, %v406_v45 }
 0x2d9   :  { %v736_v18 = vmul.f32 %v1068_v12, %v735_v16 }
 0x2da   :  { %v409_v36 = vsel %vm408_vm13, %v1070_v59, %v407_v60 }
 0x2db   :  { %v737_v38 = vmul.f32 %v736_v18, %v1533_v53 }
 0x2dc   :  { %v953_v35 = vpop.permute.xlu0 %952 }
 0x2dd   :  { %v739_v63 = vsel %vm738_vm7, %v1533_v53, %v737_v38  ;;  %v1072_v53 = vld [vmem:[#allocation3] sm:$0xff] }
 0x2de   :  { %v742_v11 = vsel %vm740_vm11, %v741_v13, %v739_v63  ;;  %v955_v24 = vsub.f32 %v1072_v53, %v953_v35 }
 0x2df   :  { %v760_v47 = vperm.slane %v742_v11, %v1549_v31 }
 0x2e0   :  { %v957_v44 = vmul.f32 %v955_v24, %v955_v24 }
 0x2e1   :  { %v774_v41 = vsel %vm773_vm10, %v760_v47, %v772_v17 }
 0x2e2   :  { %v776_v54 = vsel %vm79_vm0, %v774_v41, 0.0  ;;  %v958_v30 = vadd.f32 %v957_v44, %v956_v56 }
 0x2e3   :  { %777 = vadd.xlane.f32.xlu0 %v776_v54 }
 0x2ea   :  { %v940_v9 = vpop.permute.xlu1 %939 }
 0x2eb   :  { %v942_v10 = vsel %vm79_vm0, %v940_v9, 0.0  ;;  %vm961_vm0 = vcmp.eq.s32.totalorder %v1549_v31, 2 }
 0x2ec   :  { %943 = vadd.xlane.f32.xlu2 %v942_v10 }
 0x2f7   :  { %964 = vperm.xlu0 %1030, %v958_v30  }
 0x326   :  { %v402_v6 = vpop.xlane.xlu1 %401 }
 0x327   :  { %v410_v26 = vmul.f32 %v409_v36, %v402_v6 }
 0x356   :  { %v778_v12 = vpop.xlane.xlu0 %777 }
 0x357   :  { %v779_v32 = vmul.f32 %v778_v12, %v409_v36 }
 0x35f   :  { %v944_v57 = vpop.xlane.xlu2 %943 }
 0x360   :  { %v945_v19 = vmul.f32 %v944_v57, %v409_v36 }
 0x362   :  { %v946_v25 = vadd.f32 %v945_v19, %v779_v32 }
 0x364   :  { %v947_v2 = vmul.f32 0.5, %v946_v25 }
 0x369   :  { %v965_v61 = vpop.permute.xlu0 %964 }
 0x36a   :  { %v967_v1 = vsel %vm961_vm0, %v965_v61, 0.0 }
 0x36b   :  { %v968_v5 = vsel %vm960_vm2, %v410_v26, %v967_v1 }
 0x36c   :  { %v969_v58 = vsel %vm959_vm15, %v947_v2, %v968_v5 }
 0x36d   :  { %970 = vst [vmem:[#allocation17] sm:$0xff] %v969_v58 }
 0x36e   :  { %981 = dma.vmem_to_hbm [thread:$0]  %s977_s10, 128, %s979_s13, [#allocation11]  }
 0x36f   :  { %1200 = dma.done.wait [#allocation11], 128  }
 0x370   :  { %1201 = vsyncadd [#allocation11], 4294967168 }
 0x371   :  { %986 = vsyncpa [#allocation10], 1 }
 0x372   :  { %987 = vsyncpa [#allocation13], 1 }
 0x373   :  { %988 = vsyncpa [#allocation16], 1 }
 0x374   :  { %989 = vsyncpa [#allocation11], 1 }

</bundles_post_ra>
